<compile_context>
chip_gen: v7x
topology: tpu7x:2x2x1
jax: 0.10.0
libtpu: 0.0.40
codegen_flags: <defaults>
</compile_context>

<pallas_src>
import jax
import jax.numpy as jnp
from jax import lax
from jax.experimental import pallas as pl
from jax.experimental.pallas import tpu as pltpu


# ----------------------------------------------------------------------------
# Single-pass kernel: one block = TN full batch rows (TN, C, HW).
# ----------------------------------------------------------------------------
def sqex_kernel(x_ref, w1_ref, b1_ref, w2_ref, b2_ref, o_ref):
    # Squeeze: global average pool over the flattened spatial axis
    # (== F.avg_pool2d(kernel_size=(H, W))).  Reduce straight from the ref.
    mean = jnp.mean(x_ref[...].astype(jnp.float32), axis=2)          # (TN, C)

    # Excitation MLP: C -> C//r -> C (f32 on the MXU).
    # FC1 contracts on C with w1 kept in its native lane-dense (hidden, C).
    h = lax.dot_general(mean, w1_ref[...], (((1,), (1,)), ((), ())),
                        preferred_element_type=jnp.float32)          # (TN, hid)
    h = jnp.maximum(h + b1_ref[...], 0.0)                            # ReLU
    # FC2: (TN, hidden) @ (hidden, C) -- w2 passed transposed (lane-dense).
    s = jnp.dot(h, w2_ref[...],
                preferred_element_type=jnp.float32) + b2_ref[...]    # (TN, C)
    s = jax.nn.sigmoid(s)

    # Scale: re-read x_ref and broadcast the per-(n, c) gate over HW.
    o_ref[...] = (x_ref[...].astype(jnp.float32)
                  * s[:, :, None]).astype(o_ref.dtype)


# ----------------------------------------------------------------------------
# Tiling / VMEM planning helpers.
# ----------------------------------------------------------------------------
def _vmem_plan():
    """Return (target_block_bytes, vmem_limit_cap) sized per TPU generation."""
    try:
        cap = int(pltpu.get_tpu_info().vmem_capacity_bytes)
    except Exception:
        cap = 64 << 20                     # conservative: assume v7x (64 MiB)
    if cap >= (100 << 20):                 # v5e / v6e: 128 MiB VMEM
        return 12 << 20, 96 << 20
    return 4 << 20, 48 << 20               # v7x: 64 MiB VMEM


def _pick_tn(N, row_bytes, target_block_bytes):
    """Batch rows per block under the byte budget.  TN need NOT divide N
    (tail block may be partial).  Keeps >= 2 grid steps when N >= 2 and
    prefers an even step count (v7x dual-TensorCore balance)."""
    tn = max(1, int(target_block_bytes // max(1, row_bytes)))
    tn = min(tn, N)
    if N >= 2:
        tn = min(tn, (N + 1) // 2)                     # at least 2 grid steps
        steps = -(-N // tn)
        if steps % 2 != 0:                             # prefer even step count
            for cand in range(tn - 1, max(1, tn // 2) - 1, -1):
                if (-(-N // cand)) % 2 == 0:
                    tn = cand
                    break
    return max(1, tn)


# ----------------------------------------------------------------------------
# Two-pass fallback: gate kernel (streams x in (TN, C, T_HW) tiles with an
# accumulator) + scale kernel.  Costs one extra HBM read of x but never
# over-subscribes VMEM when a single batch row is huge (v7x guard).
# ----------------------------------------------------------------------------
def _sqex_two_pass(x_flat, w1_n, b1_2d, w2_t, b2_2d,
                   N, C, HW, hidden, itemsize,
                   target_block_bytes, vmem_cap, weight_bytes):
    io_dtype = x_flat.dtype

    # TN: multiple of 8 (or all of N when N <= 8) so the 2-D gate output's
    # (TN, C) block satisfies the (8, 128) sublane rule; then size T_HW from
    # the remaining budget (multiple of 128, or the full HW).
    tn = N if N <= 8 else 8
    max_thw = max(1, int(target_block_bytes // max(1, tn * C * itemsize)))
    if max_thw >= HW:
        t_hw = HW
    else:
        t_hw = min(HW, max(128, (max_thw // 128) * 128))

    n_blk = pl.cdiv(N, tn)
    hw_blk = pl.cdiv(HW, t_hw)
    mask_tail = (HW % t_hw) != 0
    inv_hw = float(1.0 / HW)

    block_bytes = tn * C * t_hw * itemsize
    vmem_need = 4 * block_bytes + 2 * weight_bytes + 4 * tn * C * 4 + (2 << 20)
    vmem_limit = int(min(max(vmem_need, 16 << 20), vmem_cap))

    def gate_kernel(x_ref, w1_ref, b1_ref, w2_ref, b2_ref, s_ref, acc_ref):
        hwi = pl.program_id(1)

        @pl.when(hwi == 0)
        def _():
            acc_ref[...] = jnp.zeros_like(acc_ref)

        xv = x_ref[...].astype(jnp.float32)
        if mask_tail:
            col = hwi * t_hw + lax.broadcasted_iota(jnp.int32, (1, 1, t_hw), 2)
            xv = jnp.where(col < HW, xv, 0.0)
        acc_ref[...] += jnp.sum(xv, axis=2)

        @pl.when(hwi == pl.num_programs(1) - 1)
        def _():
            mean = acc_ref[...] * jnp.float32(inv_hw)                 # (TN, C)
            h = lax.dot_general(mean, w1_ref[...], (((1,), (1,)), ((), ())),
                                preferred_element_type=jnp.float32)
            h = jnp.maximum(h + b1_ref[...], 0.0)
            s = jnp.dot(h, w2_ref[...],
                        preferred_element_type=jnp.float32) + b2_ref[...]
            s_ref[...] = jax.nn.sigmoid(s)

    gate = pl.pallas_call(
        gate_kernel,
        out_shape=jax.ShapeDtypeStruct((N, C), jnp.float32),
        grid=(n_blk, hw_blk),
        in_specs=[
            pl.BlockSpec((tn, C, t_hw), lambda n, l: (n, 0, l)),
            pl.BlockSpec((hidden, C), lambda n, l: (0, 0)),
            pl.BlockSpec((1, hidden), lambda n, l: (0, 0)),
            pl.BlockSpec((hidden, C), lambda n, l: (0, 0)),
            pl.BlockSpec((1, C), lambda n, l: (0, 0)),
        ],
        out_specs=pl.BlockSpec((tn, C), lambda n, l: (n, 0)),
        scratch_shapes=[pltpu.VMEM((tn, C), jnp.float32)],
        compiler_params=pltpu.CompilerParams(
            dimension_semantics=("parallel", "arbitrary"),
            vmem_limit_bytes=vmem_limit),
    )(x_flat, w1_n, b1_2d, w2_t, b2_2d)

    def scale_kernel(x_ref, s_ref, o_ref):
        o_ref[...] = (x_ref[...].astype(jnp.float32)
                      * s_ref[...][:, :, None]).astype(o_ref.dtype)

    out_flat = pl.pallas_call(
        scale_kernel,
        out_shape=jax.ShapeDtypeStruct((N, C, HW), io_dtype),
        grid=(n_blk, hw_blk),
        in_specs=[
            pl.BlockSpec((tn, C, t_hw), lambda n, l: (n, 0, l)),
            pl.BlockSpec((tn, C), lambda n, l: (n, 0)),
        ],
        out_specs=pl.BlockSpec((tn, C, t_hw), lambda n, l: (n, 0, l)),
        compiler_params=pltpu.CompilerParams(
            dimension_semantics=("parallel", "parallel"),
            vmem_limit_bytes=vmem_limit),
    )(x_flat, gate)
    return out_flat


# ----------------------------------------------------------------------------
# Public wrapper.
# ----------------------------------------------------------------------------
def sqex_forward(x_nchw, w1, b1, w2, b2, *,
                 force_two_pass=False, block_budget_bytes=None):
    """x_nchw: (N, C, H, W) float32 or bfloat16.  Weights in torch.nn.Linear
       layout: w1 (hidden, C), b1 (hidden,), w2 (C, hidden), b2 (C,)."""
    N, C, H, W = x_nchw.shape
    hidden = w1.shape[0]
    HW = H * W

    x_flat = jnp.asarray(x_nchw).reshape(N, C, HW)
    io_dtype = x_flat.dtype
    itemsize = jnp.dtype(io_dtype).itemsize

    w1_n = jnp.asarray(w1, jnp.float32)                 # (hidden, C) lane-dense
    w2_t = jnp.asarray(w2, jnp.float32).T               # (hidden, C) lane-dense
    b1_2d = jnp.asarray(b1, jnp.float32).reshape(1, hidden)
    b2_2d = jnp.asarray(b2, jnp.float32).reshape(1, C)

    auto_budget, vmem_cap = _vmem_plan()
    target_block_bytes = int(block_budget_bytes or auto_budget)
    weight_bytes = 4 * (w1_n.size + b1_2d.size + w2_t.size + b2_2d.size)

    row_bytes = C * HW * itemsize
    tn = _pick_tn(N, row_bytes, target_block_bytes)
    block_bytes = tn * row_bytes
    # Double-buffered x in + out blocks, resident (double-buffered) weights,
    # plus headroom.
    vmem_need = 4 * block_bytes + 2 * weight_bytes + (2 << 20)

    if force_two_pass or vmem_need > vmem_cap:
        out_flat = _sqex_two_pass(x_flat, w1_n, b1_2d, w2_t, b2_2d,
                                  N, C, HW, hidden, itemsize,
                                  target_block_bytes, vmem_cap, weight_bytes)
        return out_flat.reshape(N, C, H, W)

    vmem_limit = int(min(max(vmem_need, 16 << 20), vmem_cap))
    grid = (pl.cdiv(N, tn),)                            # tail block may be partial

    out_flat = pl.pallas_call(
        sqex_kernel,
        out_shape=jax.ShapeDtypeStruct((N, C, HW), io_dtype),
        grid=grid,
        in_specs=[
            pl.BlockSpec((tn, C, HW), lambda n: (n, 0, 0)),
            pl.BlockSpec((hidden, C), lambda n: (0, 0)),
            pl.BlockSpec((1, hidden), lambda n: (0, 0)),
            pl.BlockSpec((hidden, C), lambda n: (0, 0)),
            pl.BlockSpec((1, C), lambda n: (0, 0)),
        ],
        out_specs=pl.BlockSpec((tn, C, HW), lambda n: (n, 0, 0)),
        compiler_params=pltpu.CompilerParams(
            dimension_semantics=("parallel",),
            vmem_limit_bytes=vmem_limit),
    )(x_flat, w1_n, b1_2d, w2_t, b2_2d)

    return out_flat.reshape(N, C, H, W)


def sqex_reference(x_nchw, w1, b1, w2, b2):
    """Pure-JAX reference matching the PyTorch forward exactly (f32)."""
    x = jnp.asarray(x_nchw, jnp.float32)
    mean = jnp.mean(x, axis=(2, 3))                    # == avg_pool2d(k=(H,W))
    h = jnp.maximum(mean @ w1.T + b1, 0.0)
    s = jax.nn.sigmoid(h @ w2.T + b2)
    return x * s[:, :, None, None]


if __name__ == "__main__":
    # Shapes consistent with the module: C divisible by reduction=16.
    # N=7 (odd) exercises the non-divisible-N partial tail block (TN=4, grid=2).
    N, C, H, W = 7, 128, 16, 16
    reduction = 16
    hidden = C // reduction

    key = jax.random.PRNGKey(0)
    kx, kw1, kb1, kw2, kb2 = jax.random.split(key, 5)

    x = jax.random.normal(kx, (N, C, H, W), dtype=jnp.float32)
    bound1 = 1.0 / jnp.sqrt(jnp.float32(C))
    bound2 = 1.0 / jnp.sqrt(jnp.float32(hidden))
    w1 = jax.random.uniform(kw1, (hidden, C), jnp.float32, -bound1, bound1)
    b1 = jax.random.uniform(kb1, (hidden,), jnp.float32, -bound1, bound1)
    w2 = jax.random.uniform(kw2, (C, hidden), jnp.float32, -bound2, bound2)
    b2 = jax.random.uniform(kb2, (C,), jnp.float32, -bound2, bound2)

    ref = jax.block_until_ready(sqex_reference(x, w1, b1, w2, b2))

    # 1) Single-pass f32 path with a partial tail batch block.
    out = jax.block_until_ready(sqex_forward(x, w1, b1, w2, b2))
    assert out.shape == (N, C, H, W)
    assert jnp.allclose(out, ref, atol=1e-5, rtol=1e-5), "single-pass mismatch"

    # 2) Two-pass fallback (VMEM guard path), forced with a tiny block budget
    #    so the spatial accumulator loop is exercised.
    out2 = jax.block_until_ready(
        sqex_forward(x, w1, b1, w2, b2,
                     force_two_pass=True, block_budget_bytes=256 << 10))
    assert jnp.allclose(out2, ref, atol=1e-5, rtol=1e-5), "two-pass mismatch"

    # 3) bf16 I/O path (f32 compute inside the kernel); looser tolerance for
    #    the bf16 output cast.
    xb = x.astype(jnp.bfloat16)
    outb = jax.block_until_ready(sqex_forward(xb, w1, b1, w2, b2))
    refb = sqex_reference(xb.astype(jnp.float32), w1, b1, w2, b2)
    assert outb.dtype == jnp.bfloat16
    assert jnp.allclose(outb.astype(jnp.float32), refb, atol=5e-2, rtol=5e-2), \
        "bf16 mismatch"

    print("KERNEL_OK")
</pallas_src>

<mosaic_0001>
module attributes {stable_mosaic.version = 11 : i64} {
  func.func @sqex_kernel(%arg0: i32, %arg1: memref<4x128x256xf32, #tpu.memory_space<vmem>>, %arg2: memref<8x128xf32, #tpu.memory_space<vmem>>, %arg3: memref<1x8xf32, #tpu.memory_space<vmem>>, %arg4: memref<8x128xf32, #tpu.memory_space<vmem>>, %arg5: memref<1x128xf32, #tpu.memory_space<vmem>>, %arg6: memref<4x128x256xf32, #tpu.memory_space<vmem>>) attributes {dimension_semantics = [#tpu.dimension_semantics<parallel>], iteration_bounds = array<i64: 2>, scalar_prefetch = 0 : i64, scratch_operands = 0 : i64, tpu.core_type = #tpu.core_type<tc>, window_params = [{transform_indices = @transform_0, window_bounds = array<i64: 4, 128, 256>}, {pipeline_mode = #tpu.pipeline_mode<synchronous>, transform_indices = @transform_1, window_bounds = array<i64: 8, 128>}, {pipeline_mode = #tpu.pipeline_mode<synchronous>, transform_indices = @transform_2, window_bounds = array<i64: 1, 8>}, {pipeline_mode = #tpu.pipeline_mode<synchronous>, transform_indices = @transform_3, window_bounds = array<i64: 8, 128>}, {pipeline_mode = #tpu.pipeline_mode<synchronous>, transform_indices = @transform_4, window_bounds = array<i64: 1, 128>}, {transform_indices = @transform_5, window_bounds = array<i64: 4, 128, 256>}]} {
    %c0 = arith.constant 0 : index
    %c0_0 = arith.constant 0 : index
    %c0_1 = arith.constant 0 : index
    %0 = vector.load %arg1[%c0, %c0_0, %c0_1] : memref<4x128x256xf32, #tpu.memory_space<vmem>>, vector<4x128x256xf32>
    %cst = arith.constant dense<0.000000e+00> : vector<4x128xf32>
    %1 = vector.multi_reduction <add>, %0, %cst [2] : vector<4x128x256xf32> to vector<4x128xf32>
    %cst_2 = arith.constant 2.560000e+02 : f32
    %2 = vector.broadcast %cst_2 : f32 to vector<4x128xf32>
    %3 = arith.divf %1, %2 : vector<4x128xf32>
    %c0_3 = arith.constant 0 : index
    %c0_4 = arith.constant 0 : index
    %4 = vector.load %arg2[%c0_3, %c0_4] : memref<8x128xf32, #tpu.memory_space<vmem>>, vector<8x128xf32>
    %cst_5 = arith.constant dense<0.000000e+00> : vector<4x8xf32>
    %5 = tpu.matmul %3, %4, %cst_5 {dimension_numbers = #tpu.dot_dimension_numbers<[1], [1], [0], [0], [0, 0, 1, 0], [], []>} : vector<4x128xf32>, vector<8x128xf32>, vector<4x8xf32> -> vector<4x8xf32>
    %c0_6 = arith.constant 0 : index
    %c0_7 = arith.constant 0 : index
    %6 = vector.load %arg3[%c0_6, %c0_7] : memref<1x8xf32, #tpu.memory_space<vmem>>, vector<1x8xf32>
    %7 = vector.broadcast %6 : vector<1x8xf32> to vector<4x8xf32>
    %8 = arith.addf %5, %7 : vector<4x8xf32>
    %cst_8 = arith.constant 0.000000e+00 : f32
    %9 = vector.broadcast %cst_8 : f32 to vector<4x8xf32>
    %10 = arith.maximumf %8, %9 : vector<4x8xf32>
    %c0_9 = arith.constant 0 : index
    %c0_10 = arith.constant 0 : index
    %11 = vector.load %arg4[%c0_9, %c0_10] : memref<8x128xf32, #tpu.memory_space<vmem>>, vector<8x128xf32>
    %cst_11 = arith.constant dense<0.000000e+00> : vector<4x128xf32>
    %12 = tpu.matmul %10, %11, %cst_11 {dimension_numbers = #tpu.dot_dimension_numbers<[1], [0], [0], [1], [0, 0, 1, 1], [], []>} : vector<4x8xf32>, vector<8x128xf32>, vector<4x128xf32> -> vector<4x128xf32>
    %c0_12 = arith.constant 0 : index
    %c0_13 = arith.constant 0 : index
    %13 = vector.load %arg5[%c0_12, %c0_13] : memref<1x128xf32, #tpu.memory_space<vmem>>, vector<1x128xf32>
    %14 = vector.broadcast %13 : vector<1x128xf32> to vector<4x128xf32>
    %15 = arith.addf %12, %14 : vector<4x128xf32>
    %16 = arith.negf %15 : vector<4x128xf32>
    %17 = math.exp %16 : vector<4x128xf32>
    %cst_14 = arith.constant 1.000000e+00 : f32
    %18 = vector.broadcast %cst_14 : f32 to vector<4x128xf32>
    %19 = arith.addf %18, %17 : vector<4x128xf32>
    %20 = arith.divf %18, %19 : vector<4x128xf32>
    %c0_15 = arith.constant 0 : index
    %c0_16 = arith.constant 0 : index
    %c0_17 = arith.constant 0 : index
    %21 = vector.load %arg1[%c0_15, %c0_16, %c0_17] : memref<4x128x256xf32, #tpu.memory_space<vmem>>, vector<4x128x256xf32>
    %22 = vector.shape_cast %20 : vector<4x128xf32> to vector<4x128x1xf32>
    %23 = vector.broadcast %22 : vector<4x128x1xf32> to vector<4x128x256xf32>
    %24 = arith.mulf %21, %23 : vector<4x128x256xf32>
    %c0_18 = arith.constant 0 : index
    %c0_19 = arith.constant 0 : index
    %c0_20 = arith.constant 0 : index
    %25 = vector.load %arg6[%c0_18, %c0_19, %c0_20] : memref<4x128x256xf32, #tpu.memory_space<vmem>>, vector<4x128x256xf32>
    tpu.vector_store %arg6[%c0_18, %c0_19, %c0_20], %24 {strides = array<i32>} : memref<4x128x256xf32, #tpu.memory_space<vmem>>, vector<4x128x256xf32>,
    return
  }
  func.func @transform_0(%arg0: i32) -> (i32, i32, i32) {
    %c0_i32 = arith.constant 0 : i32
    %c0_i32_0 = arith.constant 0 : i32
    %c0_i32_1 = arith.constant 0 : i32
    return %arg0, %c0_i32, %c0_i32_0 : i32, i32, i32
  }
  func.func @transform_1(%arg0: i32) -> (i32, i32) {
    %c0_i32 = arith.constant 0 : i32
    %c0_i32_0 = arith.constant 0 : i32
    %c0_i32_1 = arith.constant 0 : i32
    return %c0_i32, %c0_i32_0 : i32, i32
  }
  func.func @transform_2(%arg0: i32) -> (i32, i32) {
    %c0_i32 = arith.constant 0 : i32
    %c0_i32_0 = arith.constant 0 : i32
    %c0_i32_1 = arith.constant 0 : i32
    return %c0_i32, %c0_i32_0 : i32, i32
  }
  func.func @transform_3(%arg0: i32) -> (i32, i32) {
    %c0_i32 = arith.constant 0 : i32
    %c0_i32_0 = arith.constant 0 : i32
    %c0_i32_1 = arith.constant 0 : i32
    return %c0_i32, %c0_i32_0 : i32, i32
  }
  func.func @transform_4(%arg0: i32) -> (i32, i32) {
    %c0_i32 = arith.constant 0 : i32
    %c0_i32_0 = arith.constant 0 : i32
    %c0_i32_1 = arith.constant 0 : i32
    return %c0_i32, %c0_i32_0 : i32, i32
  }
  func.func @transform_5(%arg0: i32) -> (i32, i32, i32) {
    %c0_i32 = arith.constant 0 : i32
    %c0_i32_0 = arith.constant 0 : i32
    %c0_i32_1 = arith.constant 0 : i32
    return %arg0, %c0_i32, %c0_i32_0 : i32, i32, i32
  }
}

</mosaic_0001>

<bundles_post_ra>
// kernel: tpu_custom_call.1
= control target key start
LH: loop header
LB: loop body
LE: loop exit
PB: predicated region body
PF: predicated region fallthrough
CT: control target
= control target key end

     0   :  { %10 = vsyncpa [#allocation3], 0  ;;  %s3273_s0 = inlined_call_operand.hbm [shape: f32[7,128,256], index: 0, kind: input, shape index: {}]   ;;  %s3274_s1 = inlined_call_operand.hbm [shape: f32[8,128], index: 1, kind: input, shape index: {}]   ;;  %s3275_s2 = inlined_call_operand.vmem [shape: f32[1,8], index: 2, kind: input, shape index: {}]   ;;  %s3276_s3 = inlined_call_operand.vmem [shape: f32[8,128], index: 3, kind: input, shape index: {}]   ;;  %s3277_s4 = inlined_call_operand.vmem [shape: f32[1,128], index: 4, kind: input, shape index: {}]   ;;  %s3278_s5 = inlined_call_operand.hbm [shape: f32[7,128,256], index: 5, kind: output, shape index: {}]  }
   0x1   :  { %12 = vsyncpa [#allocation3 + $0x1], 0 }
   0x2   :  { %13 = vsyncpa [#allocation6], 0 }
   0x3   :  { %14 = vsyncpa [#allocation4], 0 }
   0x4   :  { %16 = vsyncpa [#allocation4 + $0x1], 0  ;;  %s2299_s18 = smov 0   ;;  %s2301_s19 = smov 0  }
   0x5   :  { %s2303_s20 = smov 0   ;;  %s2305_s21 = smov 0  }
   0x6 LB: > { %s2320_s22 = sadd.s32 4294967295, %s2258_s21   ;;  %s1882_s23 = sadd.s32 4294967294, %s2258_s21   ;;  %s2258_s21 = sphi %s2305_s21, %s3319_s21   ;;  %s2254_s20 = sphi %s2303_s20, %s3318_s20   ;;  %s2250_s19 = sphi %s2301_s19, %s3317_s19   ;;  %s2246_s18 = sphi %s2299_s18, %s3316_s18  }
   0x7   : > { %s2324_s24 = sadd.s32 1, %s2258_s21   ;;  %s29_s25 = sadd.s32 1, %s2254_s20 }
   0x8   : > { %s26_s26 = ssub.s32 %s2258_s21, %s2324_s24  ;;  %p36_p0 = scmp.ne.s32.totalorder %s2254_s20, %s2250_s19 }
   0x9   : > { %p27_p1 = scmp.eq.s32.totalorder %s26_s26, 0  ;;  %p37_p2 = scmp.eq.s32.totalorder %s2258_s21, 0 }
   0xa   : > { %p42_p3 = scmp.ne.s32.totalorder %s2250_s19, %s2246_s18  ;;  %p3279_p4 = scmp.eq.s32.totalorder %s2320_s22, 0 }
   0xb   : > { %s2336_s27 = scalar_select %p27_p1, %s2254_s20, %s29_s25  }
   0xc   : > { %p2338_p5 = por %p37_p2, %p36_p0  ;;  %p2344_p6 = por %p3279_p4, %p42_p3 }
   0xd   : > { %p150_p7 = scmp.eq.s32.totalorder %s2320_s22, 1  ;;  %p156_p8 = scmp.eq.s32.totalorder %s1882_s23, 1 }
   0xe   : > { %s3287_s28 = scalar_select %p2338_p5, 1, 0 }
   0xf   : > { %s3288_s29 = scalar_select %p2344_p6, 1, 0 }
  0x10   : > { %p1883_p9 = scmp.ge.s32.totalorder %s2258_s21, 1  ;;  %p163_p10 = scmp.lt.s32.totalorder %s2258_s21, 3 }
  0x11   : > { %p2351_p11 = por %p150_p7, %p36_p0  ;;  %p2355_p12 = por %p156_p8, %p42_p3 }
  0x12   : > { %p2359_p13 = pnand %p1883_p9, %p163_p10  ;;  %s2260_s8 = smov [#allocation5]  }
  0x13   : > { %s3289_s30 = scalar_select %p2351_p11, 1, 0 }
  0x14   : > { %s3290_s6 = scalar_select %p2355_p12, 1, 0 }
  0x15   : > { %s3291_s7 = scalar_select %p2359_p13, 1, 0 }
  0x16   : > { %p1950_p1 = pneg %p2359_p13  ;;  %s176_s9 = sshll.u32 %s2260_s8, 4  ;;  %s177_s9 = int_to_ptr.vmem [resolvable:$true] %s176_s9 }
  0x17   : > { %s2132_s13 = scalar_lea.hbm %s3274_s1, 128 }
  0x18   : > { %p2367_p2 = pnand %p1950_p1, %p3279_p4  ;;  %p2133_p0 = scmp.ne.s32.totalorder %s3274_s1, %s2132_s13 }
  0x19   : > { %p2139_p9 = scmp.lt.u32.totalorder %s2132_s13, %s3274_s1 }
  0x1a   : > { %p2134_p3 = pneg %p2367_p2 }
  0x1c   : > { %p2135_p7 = pnand %p2134_p3, %p2133_p0 }
  0x1e   : > { %p2136_p8 = pneg %p2135_p7 }
  0x20   : > { %p2141_p10 = pnand %p2139_p9, %p2136_p8 }
  0x22   : > { %2144 = shalt.err (!%p2141_p10)
}
  0x23   : > { %s2145_s23 = scalar_lea.vmem %s177_s9, 128  ;;  %p2153_p11 = scmp.lt.s32.totalorder %s177_s9, %s177_s9 }
  0x24   : > { %p2146_p1 = scmp.ne.s32.totalorder %s177_s9, %s2145_s23  ;;  %p2154_p6 = scmp.lt.s32.totalorder %s2145_s23, %s2145_s23 }
  0x26   : > { %p2148_p4 = pnand %p2146_p1, %p2134_p3  ;;  %p2155_p13 = por %p2154_p6, %p2153_p11 }
  0x28   : > { %p2149_p12 = pneg %p2148_p4 }
  0x2a   : > { %p2156_p5 = pnand %p2155_p13, %p2149_p12 }
  0x2c   : > { %2159 = shalt.err (!%p2156_p5)
}
  0x2d   : > { %1953 = dma.hbm_to_vmem [thread:$0]  (!%p2367_p2), %s3274_s1, 128, %s177_s9, [#allocation6]  }
  0x2e   : > { %p1885_p0 = scmp.ge.s32.totalorder %s2258_s21, 2 }
  0x2f   : > { %p3293_p7 = scmp.ne.s32.totalorder (!%p1885_p0), %s3287_s28, 0 }
  0x30   : > { %192 = sbr.rel (%p1885_p0) target bundleno = 90 (0x5a), region = 32 }
  0x37   : > { %195 = sbr.rel (!%p3293_p7) target bundleno = 90 (0x5a), region = 36  ;;  %s196_s8 = sand.u32 (%p3293_p7), 1, %s2254_s20  }
  0x38   : > { %s1887_s11 = sshll.u32 (%p3293_p7), %s2258_s21, 2  ;;  %s1886_s12 = sshll.u32 (%p3293_p7), %s196_s8, 10 }
  0x39   : > { %s202_s13 = ssub.s32 (%p3293_p7), 7, %s1887_s11  ;;  %s2397_s14 = scalar_lea.sflag (%p3293_p7), [#allocation3], %s196_s8 }
  0x3a   : > { %p203_p4 = scmp.lt.s32.totalorder (%p3293_p7), %s202_s13, 4  ;;  %s200_s15 = scalar_lea.vmem (%p3293_p7), [#allocation2], %s1886_s12 }
  0x3e   : > { %s3321_s13 = smov (!%p203_p4, %s202_s13), 4 }
  0x3f   : > { %s2394_s10 = sshll.u32 %s3321_s13, 12 }
  0x40   : > { %s209_s9 = ssub.s32 16384, %s2394_s10 }
  0x41   : > { %210 = vsyncadd %s2397_s14, %s209_s9  ;;  %p1891_p5 = scmp.ne.s32.totalorder %s2394_s10, 0  ;;  %s1921_s28 = sshll.u32 %s2258_s21, 14 }
  0x42   : > { %s2405_s23 = scalar_lea.hbm %s3273_s0, %s1921_s28  ;;  %s217_s25 = sshll.u32 %s200_s15, 4  ;;  %s2407_s25 = int_to_ptr.vmem [resolvable:$true] %s217_s25 }
  0x43   : > { %s2160_s26 = scalar_lea.hbm %s2405_s23, %s2394_s10  ;;  %s2164_s12 = scalar_lea.hbm %s3273_s0, 28672 }
  0x44   : > { %p2161_p6 = scmp.ne.s32.totalorder %s2405_s23, %s2160_s26  ;;  %p2165_p13 = scmp.lt.u32.totalorder %s2405_s23, %s3273_s0 }
  0x45   : > { %p2166_p2 = scmp.lt.u32.totalorder %s2164_s12, %s2160_s26  ;;  %p2168_p8 = scmp.lt.u32.totalorder %s2160_s26, %s2405_s23 }
  0x46   : > { %p2162_p11 = pnand %p2161_p6, %p1891_p5 }
  0x47   : > { %p2167_p3 = por %p2166_p2, %p2165_p13 }
  0x48   : > { %p2163_p12 = pneg %p2162_p11 }
  0x49   : > { %p2169_p9 = por %p2168_p8, %p2167_p3 }
  0x4b   : > { %p2170_p10 = pnand %p2169_p9, %p2163_p12 }
  0x4d   : > { %2173 = shalt.err (!%p2170_p10)
}
  0x4e   : > { %s2174_s15 = scalar_lea.vmem %s2407_s25, %s2394_s10  ;;  %s2261_s28 = smov [#allocation2]  }
  0x4f   : > { %p2175_p1 = scmp.ne.s32.totalorder %s2407_s25, %s2174_s15  ;;  %s2178_s16 = sshll.u32 %s2261_s28, 4  ;;  %s2179_s16 = int_to_ptr.vmem [resolvable:$false] %s2178_s16 }
  0x50   : > { %s2180_s17 = scalar_lea.vmem %s2179_s16, 32768  ;;  %p2181_p6 = scmp.lt.s32.totalorder %s2407_s25, %s2179_s16 }
  0x51   : > { %p2176_p7 = pnand %p2175_p1, %p1891_p5  ;;  %p2182_p11 = scmp.lt.s32.totalorder %s2180_s17, %s2174_s15 }
  0x53   : > { %p2177_p4 = pneg %p2176_p7  ;;  %p2183_p13 = por %p2182_p11, %p2181_p6 }
  0x55   : > { %p2184_p2 = pnand %p2183_p13, %p2177_p4 }
  0x57   : > { %2187 = shalt.err (!%p2184_p2)
}
  0x58   : > { %s2262_s26 = smov 256   ;;  %s2263_s8 = smov 16  }
  0x59   : > { %223 = dma.hbm_to_vmem [thread:$0]  (%p1891_p5), %s2405_s23, %s2394_s10, %s2407_s25, %s2397_s14, %s2262_s26, %s2262_s26, %s2263_s8  }
  0x5a PF: > { %p3294_p12 = scmp.ne.s32.totalorder %s3291_s7, 0 }
  0x5c   : > { %229 = sbr.rel (%p3294_p12) target bundleno = 1115 (0x45b), region = 40 }
  0x63   : > { %s2437_s11 = sand.u32 1, %s2250_s19   ;;  %p3295_p3 = scmp.ne.s32.totalorder %s3288_s29, 0 }
  0x64   : > { %s1898_s12 = sshll.u32 %s2437_s11, 10  ;;  %s232_s13 = scalar_lea.sflag [#allocation3], %s2437_s11 }
  0x65   : > { %s2443_s9 = scalar_lea.vmem [#allocation2], %s1898_s12 }
  0x66   : > { %2233 = dma.done.wait (%p3295_p3), %s232_s13, 16384  }
  0x67   : > { %2235 = vsyncadd (%p3295_p3), %s232_s13, 4294950912  ;;  %p3296_p5 = scmp.eq.s32.totalorder %s2320_s22, 0 }
  0x69   : > { %2237 = dma.done.wait (%p3296_p5), [#allocation6], 128   ;;  %p3297_p8 = pmov %p3296_p5 }
  0x6a   : > { %v312_v0 = vld [vmem:[%s2443_s9 + $0x100] sm:$0xff]  ;;  %v313_v1 = vld [vmem:[%s2443_s9 + $0x108] sm:$0xff]  ;;  %v314_v5 = vld [vmem:[%s2443_s9 + $0x110] sm:$0xff]  ;;  %vm2265_vm0 = vmmov 0   ;;  %vm748_vm1 = vcmask 130112   ;;  %vm755_vm2 = vcmask 195712  }
  0x6b   : > { %2239 = vsyncadd (%p3297_p8), [#allocation6], 4294967168  ;;  %v280_v2 = vld [vmem:[%s2443_s9] sm:$0xff]  ;;  %v456_v3 = vadd.f32 %v313_v1, %v312_v0  ;;  %v281_v4 = vld [vmem:[%s2443_s9 + $0x8] sm:$0xff]  ;;  %vm762_vm3 = vcmask 261312   ;;  %vm769_vm4 = vcmask 326912  }
  0x6c   : > { %v315_v6 = vld [vmem:[%s2443_s9 + $0x118] sm:$0xff]  ;;  %v408_v7 = vadd.f32 %v281_v4, %v280_v2  ;;  %v282_v8 = vld [vmem:[%s2443_s9 + $0x10] sm:$0xff]  ;;  %v316_v12 = vld [vmem:[%s2443_s9 + $0x120] sm:$0xff]  ;;  %vm776_vm5 = vcmask 392512   ;;  %vm783_vm6 = vcmask 458112   ;;  %vm790_vm7 = vcmask 523712  }
  0x6d   : > { %v283_v9 = vld [vmem:[%s2443_s9 + $0x18] sm:$0xff]  ;;  %457 = vadd.xlane.f32.xlu1 %v456_v3  ;;  %v459_v10 = vadd.f32 %v315_v6, %v314_v5  ;;  %v317_v13 = vld [vmem:[%s2443_s9 + $0x128] sm:$0xff]  ;;  %v284_v14 = vld [vmem:[%s2443_s9 + $0x20] sm:$0xff]  ;;  %vm797_vm8 = vcmask 589312   ;;  %vm804_vm9 = vcmask 654912   ;;  %vm811_vm10 = vcmask 720512  }
  0x6e   : > { %409 = vadd.xlane.f32.xlu0 %v408_v7  ;;  %v411_v11 = vadd.f32 %v283_v9, %v282_v8  ;;  %v285_v15 = vld [vmem:[%s2443_s9 + $0x28] sm:$0xff]  ;;  %v462_v16 = vadd.f32 %v317_v13, %v316_v12  ;;  %v346_v18 = vld [vmem:[%s2443_s9 + $0x210] sm:$0xff]  ;;  %v347_v19 = vld [vmem:[%s2443_s9 + $0x218] sm:$0xff]  ;;  %vm818_vm11 = vcmask 786112   ;;  %vm825_vm12 = vcmask 851712   ;;  %s2952_s15 = scalar_lea.vmem [#allocation7], %s1898_s12 }
  0x6f   : > { %v414_v17 = vadd.f32 %v285_v15, %v284_v14  ;;  %v344_v20 = vld [vmem:[%s2443_s9 + $0x200] sm:$0xff]  ;;  %v345_v21 = vld [vmem:[%s2443_s9 + $0x208] sm:$0xff]  ;;  %v507_v22 = vadd.f32 %v347_v19, %v346_v18  ;;  %v318_v24 = vld [vmem:[%s2443_s9 + $0x130] sm:$0xff]  ;;  %vm832_vm13 = vcmask 917312   ;;  %vm839_vm14 = vcmask 982912   ;;  %s1776_s28 = scalar_lea.sflag [#allocation4], %s2437_s11 }
  0x70   : > { %v504_v23 = vadd.f32 %v345_v21, %v344_v20  ;;  %v319_v25 = vld [vmem:[%s2443_s9 + $0x138] sm:$0xff]  ;;  %v286_v26 = vld [vmem:[%s2443_s9 + $0x30] sm:$0xff]  ;;  %v376_v30 = vld [vmem:[%s2443_s9 + $0x300] sm:$0xff]  ;;  %vm846_vm15 = vcmask 1048512   ;;  %p3314_p9 = scmp.ne.s32.totalorder %s3289_s30, 0 }
  0x71   : > { %460 = vadd.xlane.f32.xlu1 %v459_v10  ;;  %v287_v27 = vld [vmem:[%s2443_s9 + $0x38] sm:$0xff]  ;;  %v465_v28 = vadd.f32 %v319_v25, %v318_v24  ;;  %v377_v31 = vld [vmem:[%s2443_s9 + $0x308] sm:$0xff]  ;;  %v348_v32 = vld [vmem:[%s2443_s9 + $0x220] sm:$0xff]  ;;  %s1906_s16 = sshll.u32 (%p3314_p9), %s2320_s22, 2 }
  0x72   : > { %412 = vadd.xlane.f32.xlu0 %v411_v11  ;;  %v417_v29 = vadd.f32 %v287_v27, %v286_v26  ;;  %v349_v33 = vld [vmem:[%s2443_s9 + $0x228] sm:$0xff]  ;;  %v552_v34 = vadd.f32 %v377_v31, %v376_v30  ;;  %v288_v36 = vld [vmem:[%s2443_s9 + $0x40] sm:$0xff]  ;;  %v378_v38 = vld [vmem:[%s2443_s9 + $0x310] sm:$0xff]  ;;  %s1784_s17 = ssub.s32 (%p3314_p9), 7, %s1906_s16 }
  0x73   : > { %v510_v35 = vadd.f32 %v349_v33, %v348_v32  ;;  %v289_v37 = vld [vmem:[%s2443_s9 + $0x48] sm:$0xff]  ;;  %v379_v39 = vld [vmem:[%s2443_s9 + $0x318] sm:$0xff]  ;;  %v350_v42 = vld [vmem:[%s2443_s9 + $0x230] sm:$0xff]  ;;  %p1785_p10 = scmp.lt.s32.totalorder (%p3314_p9), %s1784_s17, 4 }
  0x74   : > { %v420_v40 = vadd.f32 %v289_v37, %v288_v36  ;;  %v555_v41 = vadd.f32 %v379_v39, %v378_v38  ;;  %v351_v43 = vld [vmem:[%s2443_s9 + $0x238] sm:$0xff]  ;;  %v320_v44 = vld [vmem:[%s2443_s9 + $0x140] sm:$0xff]  ;;  %v321_v45 = vld [vmem:[%s2443_s9 + $0x148] sm:$0xff] }
  0x75   : > { %463 = vadd.xlane.f32.xlu1 %v462_v16  ;;  %v513_v46 = vadd.f32 %v351_v43, %v350_v42  ;;  %v468_v47 = vadd.f32 %v321_v45, %v320_v44  ;;  %v290_v48 = vld [vmem:[%s2443_s9 + $0x50] sm:$0xff]  ;;  %v291_v49 = vld [vmem:[%s2443_s9 + $0x58] sm:$0xff]  ;;  %v380_v50 = vld [vmem:[%s2443_s9 + $0x320] sm:$0xff] }
  0x76   : > { %415 = vadd.xlane.f32.xlu0 %v414_v17  ;;  %v381_v51 = vld [vmem:[%s2443_s9 + $0x328] sm:$0xff]  ;;  %v423_v52 = vadd.f32 %v291_v49, %v290_v48  ;;  %v352_v54 = vld [vmem:[%s2443_s9 + $0x240] sm:$0xff]  ;;  %v322_v56 = vld [vmem:[%s2443_s9 + $0x150] sm:$0xff] }
  0x77   : > { %v558_v53 = vadd.f32 %v381_v51, %v380_v50  ;;  %v353_v55 = vld [vmem:[%s2443_s9 + $0x248] sm:$0xff]  ;;  %v323_v57 = vld [vmem:[%s2443_s9 + $0x158] sm:$0xff]  ;;  %v292_v60 = vld [vmem:[%s2443_s9 + $0x60] sm:$0xff] }
  0x78   : > { %v516_v58 = vadd.f32 %v353_v55, %v352_v54  ;;  %v471_v59 = vadd.f32 %v323_v57, %v322_v56  ;;  %v293_v61 = vld [vmem:[%s2443_s9 + $0x68] sm:$0xff]  ;;  %v382_v62 = vld [vmem:[%s2443_s9 + $0x330] sm:$0xff]  ;;  %v383_v63 = vld [vmem:[%s2443_s9 + $0x338] sm:$0xff] }
  0x79   : > { %508 = vadd.xlane.f32.xlu1 %v507_v22  ;;  %v426_v0 = vadd.f32 %v293_v61, %v292_v60  ;;  %v561_v1 = vadd.f32 %v383_v63, %v382_v62  ;;  %v354_v2 = vld [vmem:[%s2443_s9 + $0x250] sm:$0xff]  ;;  %v355_v3 = vld [vmem:[%s2443_s9 + $0x258] sm:$0xff]  ;;  %v324_v4 = vld [vmem:[%s2443_s9 + $0x160] sm:$0xff] }
  0x7a   : > { %505 = vadd.xlane.f32.xlu0 %v504_v23  ;;  %v325_v5 = vld [vmem:[%s2443_s9 + $0x168] sm:$0xff]  ;;  %v519_v6 = vadd.f32 %v355_v3, %v354_v2  ;;  %v294_v8 = vld [vmem:[%s2443_s9 + $0x70] sm:$0xff]  ;;  %v295_v9 = vld [vmem:[%s2443_s9 + $0x78] sm:$0xff] }
  0x7b   : > { %v474_v7 = vadd.f32 %v325_v5, %v324_v4  ;;  %v384_v10 = vld [vmem:[%s2443_s9 + $0x340] sm:$0xff]  ;;  %v385_v11 = vld [vmem:[%s2443_s9 + $0x348] sm:$0xff]  ;;  %v429_v12 = vadd.f32 %v295_v9, %v294_v8  ;;  %v326_v16 = vld [vmem:[%s2443_s9 + $0x170] sm:$0xff] }
  0x7c   : > { %v564_v13 = vadd.f32 %v385_v11, %v384_v10  ;;  %v356_v14 = vld [vmem:[%s2443_s9 + $0x260] sm:$0xff]  ;;  %v357_v15 = vld [vmem:[%s2443_s9 + $0x268] sm:$0xff]  ;;  %v327_v17 = vld [vmem:[%s2443_s9 + $0x178] sm:$0xff] }
  0x7d   : > { %466 = vadd.xlane.f32.xlu1 %v465_v28  ;;  %v522_v18 = vadd.f32 %v357_v15, %v356_v14  ;;  %v477_v19 = vadd.f32 %v327_v17, %v326_v16  ;;  %v296_v20 = vld [vmem:[%s2443_s9 + $0x80] sm:$0xff]  ;;  %v297_v21 = vld [vmem:[%s2443_s9 + $0x88] sm:$0xff]  ;;  %v386_v22 = vld [vmem:[%s2443_s9 + $0x350] sm:$0xff] }
  0x7e   : > { %418 = vadd.xlane.f32.xlu0 %v417_v29  ;;  %v387_v23 = vld [vmem:[%s2443_s9 + $0x358] sm:$0xff]  ;;  %v432_v24 = vadd.f32 %v297_v21, %v296_v20  ;;  %v358_v26 = vld [vmem:[%s2443_s9 + $0x270] sm:$0xff]  ;;  %v328_v28 = vld [vmem:[%s2443_s9 + $0x180] sm:$0xff] }
  0x7f   : > { %v567_v25 = vadd.f32 %v387_v23, %v386_v22  ;;  %v359_v27 = vld [vmem:[%s2443_s9 + $0x278] sm:$0xff]  ;;  %v329_v29 = vld [vmem:[%s2443_s9 + $0x188] sm:$0xff]  ;;  %v298_v32 = vld [vmem:[%s2443_s9 + $0x90] sm:$0xff] }
  0x80   : > { %v525_v30 = vadd.f32 %v359_v27, %v358_v26  ;;  %v480_v31 = vadd.f32 %v329_v29, %v328_v28  ;;  %v299_v33 = vld [vmem:[%s2443_s9 + $0x98] sm:$0xff]  ;;  %v360_v38 = vld [vmem:[%s2443_s9 + $0x280] sm:$0xff]  ;;  %v361_v39 = vld [vmem:[%s2443_s9 + $0x288] sm:$0xff] }
  0x81   : > { %553 = vadd.xlane.f32.xlu1 %v552_v34  ;;  %v388_v34 = vld [vmem:[%s2443_s9 + $0x360] sm:$0xff]  ;;  %v435_v36 = vadd.f32 %v299_v33, %v298_v32  ;;  %v528_v42 = vadd.f32 %v361_v39, %v360_v38  ;;  %v301_v45 = vld [vmem:[%s2443_s9 + $0xa8] sm:$0xff]  ;;  %v362_v50 = vld [vmem:[%s2443_s9 + $0x290] sm:$0xff] }
  0x82   : > { %511 = vadd.xlane.f32.xlu0 %v510_v35  ;;  %v389_v35 = vld [vmem:[%s2443_s9 + $0x368] sm:$0xff]  ;;  %v300_v44 = vld [vmem:[%s2443_s9 + $0xa0] sm:$0xff]  ;;  %v363_v51 = vld [vmem:[%s2443_s9 + $0x298] sm:$0xff] }
  0x83   : > { %v570_v37 = vadd.f32 %v389_v35, %v388_v34  ;;  %v438_v48 = vadd.f32 %v301_v45, %v300_v44  ;;  %v531_v54 = vadd.f32 %v363_v51, %v362_v50  ;;  %v302_v56 = vld [vmem:[%s2443_s9 + $0xb0] sm:$0xff]  ;;  %v303_v57 = vld [vmem:[%s2443_s9 + $0xb8] sm:$0xff]  ;;  %v364_v62 = vld [vmem:[%s2443_s9 + $0x2a0] sm:$0xff] }
  0x84   : > { %v441_v60 = vadd.f32 %v303_v57, %v302_v56  ;;  %v365_v63 = vld [vmem:[%s2443_s9 + $0x2a8] sm:$0xff]  ;;  %v304_v4 = vld [vmem:[%s2443_s9 + $0xc0] sm:$0xff]  ;;  %v366_v10 = vld [vmem:[%s2443_s9 + $0x2b0] sm:$0xff] }
  0x85   : > { %421 = vadd.xlane.f32.xlu1 %v420_v40  ;;  %v330_v40 = vld [vmem:[%s2443_s9 + $0x190] sm:$0xff]  ;;  %v534_v2 = vadd.f32 %v365_v63, %v364_v62  ;;  %v305_v5 = vld [vmem:[%s2443_s9 + $0xc8] sm:$0xff]  ;;  %v367_v11 = vld [vmem:[%s2443_s9 + $0x2b8] sm:$0xff] }
  0x86   : > { %556 = vadd.xlane.f32.xlu0 %v555_v41  ;;  %v331_v41 = vld [vmem:[%s2443_s9 + $0x198] sm:$0xff]  ;;  %v444_v8 = vadd.f32 %v305_v5, %v304_v4  ;;  %v537_v14 = vadd.f32 %v367_v11, %v366_v10  ;;  %v306_v16 = vld [vmem:[%s2443_s9 + $0xd0] sm:$0xff]  ;;  %v368_v22 = vld [vmem:[%s2443_s9 + $0x2c0] sm:$0xff] }
  0x87   : > { %v483_v43 = vadd.f32 %v331_v41, %v330_v40  ;;  %v307_v17 = vld [vmem:[%s2443_s9 + $0xd8] sm:$0xff]  ;;  %v369_v23 = vld [vmem:[%s2443_s9 + $0x2c8] sm:$0xff]  ;;  %v308_v28 = vld [vmem:[%s2443_s9 + $0xe0] sm:$0xff] }
  0x88   : > { %v447_v20 = vadd.f32 %v307_v17, %v306_v16  ;;  %v540_v26 = vadd.f32 %v369_v23, %v368_v22  ;;  %v309_v29 = vld [vmem:[%s2443_s9 + $0xe8] sm:$0xff]  ;;  %v370_v34 = vld [vmem:[%s2443_s9 + $0x2d0] sm:$0xff]  ;;  %v371_v35 = vld [vmem:[%s2443_s9 + $0x2d8] sm:$0xff] }
  0x89   : > { %514 = vadd.xlane.f32.xlu1 %v513_v46  ;;  %v390_v46 = vld [vmem:[%s2443_s9 + $0x370] sm:$0xff]  ;;  %v450_v32 = vadd.f32 %v309_v29, %v308_v28  ;;  %v543_v38 = vadd.f32 %v371_v35, %v370_v34  ;;  %v311_v41 = vld [vmem:[%s2443_s9 + $0xf8] sm:$0xff] }
  0x8a   : > { %469 = vadd.xlane.f32.xlu0 %v468_v47  ;;  %v391_v47 = vld [vmem:[%s2443_s9 + $0x378] sm:$0xff]  ;;  %v310_v40 = vld [vmem:[%s2443_s9 + $0xf0] sm:$0xff] }
  0x8b   : > { %v573_v49 = vadd.f32 %v391_v47, %v390_v46  ;;  %v453_v44 = vadd.f32 %v311_v41, %v310_v40  ;;  %v372_v46 = vld [vmem:[%s2443_s9 + $0x2e0] sm:$0xff]  ;;  %v373_v47 = vld [vmem:[%s2443_s9 + $0x2e8] sm:$0xff] }
  0x8c   : > { %v546_v50 = vadd.f32 %v373_v47, %v372_v46 }
  0x8d   : > { %424 = vadd.xlane.f32.xlu1 %v423_v52  ;;  %v332_v52 = vld [vmem:[%s2443_s9 + $0x1a0] sm:$0xff] }
  0x8e   : > { %559 = vadd.xlane.f32.xlu0 %v558_v53  ;;  %v333_v53 = vld [vmem:[%s2443_s9 + $0x1a8] sm:$0xff] }
  0x8f   : > { %v486_v55 = vadd.f32 %v333_v53, %v332_v52  ;;  %v374_v52 = vld [vmem:[%s2443_s9 + $0x2f0] sm:$0xff]  ;;  %v375_v53 = vld [vmem:[%s2443_s9 + $0x2f8] sm:$0xff] }
  0x90   : > { %v549_v56 = vadd.f32 %v375_v53, %v374_v52 }
  0x91   : > { %517 = vadd.xlane.f32.xlu1 %v516_v58  ;;  %v392_v58 = vld [vmem:[%s2443_s9 + $0x380] sm:$0xff] }
  0x92   : > { %472 = vadd.xlane.f32.xlu0 %v471_v59  ;;  %v393_v59 = vld [vmem:[%s2443_s9 + $0x388] sm:$0xff] }
  0x93   : > { %v576_v61 = vadd.f32 %v393_v59, %v392_v58  ;;  %v406_v58 = vld [vmem:[%s2443_s9 + $0x3f0] sm:$0xff]  ;;  %v407_v59 = vld [vmem:[%s2443_s9 + $0x3f8] sm:$0xff] }
  0x94   : > { %v597_v62 = vadd.f32 %v407_v59, %v406_v58 }
  0x95   : > { %427 = vadd.xlane.f32.xlu1 %v426_v0  ;;  %v334_v0 = vld [vmem:[%s2443_s9 + $0x1b0] sm:$0xff] }
  0x96   : > { %562 = vadd.xlane.f32.xlu0 %v561_v1  ;;  %v335_v1 = vld [vmem:[%s2443_s9 + $0x1b8] sm:$0xff] }
  0x97   : > { %v489_v3 = vadd.f32 %v335_v1, %v334_v0  ;;  %v665_v1 = vld [vmem:[#allocation5] sm:$0xff] }
  0x99   : > { %520 = vadd.xlane.f32.xlu1 %v519_v6  ;;  %v394_v6 = vld [vmem:[%s2443_s9 + $0x390] sm:$0xff] }
  0x9a   : > { %475 = vadd.xlane.f32.xlu0 %v474_v7  ;;  %v395_v7 = vld [vmem:[%s2443_s9 + $0x398] sm:$0xff] }
  0x9b   : > { %v579_v9 = vadd.f32 %v395_v7, %v394_v6 }
  0x9d   : > { %430 = vadd.xlane.f32.xlu1 %v429_v12  ;;  %v336_v12 = vld [vmem:[%s2443_s9 + $0x1c0] sm:$0xff] }
  0x9e   : > { %565 = vadd.xlane.f32.xlu0 %v564_v13  ;;  %v337_v13 = vld [vmem:[%s2443_s9 + $0x1c8] sm:$0xff] }
  0x9f   : > { %v492_v15 = vadd.f32 %v337_v13, %v336_v12 }
  0xa1   : > { %523 = vadd.xlane.f32.xlu1 %v522_v18  ;;  %v396_v18 = vld [vmem:[%s2443_s9 + $0x3a0] sm:$0xff] }
  0xa2   : > { %478 = vadd.xlane.f32.xlu0 %v477_v19  ;;  %v397_v19 = vld [vmem:[%s2443_s9 + $0x3a8] sm:$0xff] }
  0xa3   : > { %v582_v21 = vadd.f32 %v397_v19, %v396_v18 }
  0xa5   : > { %433 = vadd.xlane.f32.xlu1 %v432_v24  ;;  %v338_v24 = vld [vmem:[%s2443_s9 + $0x1d0] sm:$0xff] }
  0xa6   : > { %568 = vadd.xlane.f32.xlu0 %v567_v25  ;;  %v339_v25 = vld [vmem:[%s2443_s9 + $0x1d8] sm:$0xff] }
  0xa7   : > { %v495_v27 = vadd.f32 %v339_v25, %v338_v24 }
  0xa9   : > { %526 = vadd.xlane.f32.xlu1 %v525_v30  ;;  %v398_v30 = vld [vmem:[%s2443_s9 + $0x3b0] sm:$0xff] }
  0xaa   : > { %481 = vadd.xlane.f32.xlu0 %v480_v31  ;;  %v399_v31 = vld [vmem:[%s2443_s9 + $0x3b8] sm:$0xff] }
  0xab   : > { %v585_v33 = vadd.f32 %v399_v31, %v398_v30 }
  0xad   : > { %436 = vadd.xlane.f32.xlu1 %v435_v36  ;;  %v340_v36 = vld [vmem:[%s2443_s9 + $0x1e0] sm:$0xff] }
  0xae   : > { %571 = vadd.xlane.f32.xlu0 %v570_v37  ;;  %v341_v37 = vld [vmem:[%s2443_s9 + $0x1e8] sm:$0xff] }
  0xaf   : > { %v498_v39 = vadd.f32 %v341_v37, %v340_v36  ;;  %v737_v36 = vlaneseq }
  0xb1   : > { %529 = vadd.xlane.f32.xlu1 %v528_v42  ;;  %v400_v42 = vld [vmem:[%s2443_s9 + $0x3c0] sm:$0xff]  ;;  %v2655_v41 = vshrl.u32 %v737_v36, 7 }
  0xb2   : > { %484 = vadd.xlane.f32.xlu0 %v483_v43  ;;  %v401_v43 = vld [vmem:[%s2443_s9 + $0x3c8] sm:$0xff] }
  0xb3   : > { %v588_v45 = vadd.f32 %v401_v43, %v400_v42 }
  0xb5   : > { %439 = vadd.xlane.f32.xlu1 %v438_v48  ;;  %v342_v48 = vld [vmem:[%s2443_s9 + $0x1f0] sm:$0xff] }
  0xb6   : > { %574 = vadd.xlane.f32.xlu0 %v573_v49  ;;  %v343_v49 = vld [vmem:[%s2443_s9 + $0x1f8] sm:$0xff] }
  0xb7   : > { %v501_v51 = vadd.f32 %v343_v49, %v342_v48 }
  0xb9   : > { %532 = vadd.xlane.f32.xlu1 %v531_v54  ;;  %v402_v54 = vld [vmem:[%s2443_s9 + $0x3d0] sm:$0xff] }
  0xba   : > { %487 = vadd.xlane.f32.xlu0 %v486_v55  ;;  %v403_v55 = vld [vmem:[%s2443_s9 + $0x3d8] sm:$0xff] }
  0xbb   : > { %v591_v57 = vadd.f32 %v403_v55, %v402_v54 }
  0xbd   : > { %442 = vadd.xlane.f32.xlu1 %v441_v60  ;;  %v404_v60 = vld [vmem:[%s2443_s9 + $0x3e0] sm:$0xff] }
  0xbe   : > { %577 = vadd.xlane.f32.xlu0 %v576_v61  ;;  %v405_v61 = vld [vmem:[%s2443_s9 + $0x3e8] sm:$0xff] }
  0xbf   : > { %v594_v63 = vadd.f32 %v405_v61, %v404_v60 }
  0xc1   : > { %535 = vadd.xlane.f32.xlu1 %v534_v2 }
  0xc2   : > { %490 = vadd.xlane.f32.xlu0 %v489_v3  ;;  %v2264_v3 = vmov 0.0  }
  0xc3   : > { %1934 = vmatprep.subr.mxu0 %v2264_v3  ;;  %1936 = vmatprep.mubr.msk.f32.mxu0 %vm2265_vm0, %v2264_v3 }
  0xc4   : > { %1935 = vmatpush3.xpose.msra.mxu0 %v665_v1  ;;  %1939 = vmatprep.subr.mxu1 %v2264_v3 }
  0xc5   : > { %445 = vadd.xlane.f32.xlu1 %v444_v8  ;;  %1941 = vmatprep.mubr.msk.f32.mxu1 %vm2265_vm0, %v2264_v3  ;;  %vm1085_vm0 = vcmask 1041409  }
  0xc6   : > { %580 = vadd.xlane.f32.xlu0 %v579_v9 }
  0xc9   : > { %538 = vadd.xlane.f32.xlu1 %v537_v14 }
  0xca   : > { %493 = vadd.xlane.f32.xlu0 %v492_v15 }
  0xcd   : > { %448 = vadd.xlane.f32.xlu1 %v447_v20 }
  0xce   : > { %583 = vadd.xlane.f32.xlu0 %v582_v21 }
  0xd1   : > { %541 = vadd.xlane.f32.xlu1 %v540_v26 }
  0xd2   : > { %496 = vadd.xlane.f32.xlu0 %v495_v27 }
  0xd5   : > { %451 = vadd.xlane.f32.xlu1 %v450_v32 }
  0xd6   : > { %586 = vadd.xlane.f32.xlu0 %v585_v33 }
  0xd9   : > { %544 = vadd.xlane.f32.xlu1 %v543_v38 }
  0xda   : > { %499 = vadd.xlane.f32.xlu0 %v498_v39  ;;  %v738_v39 = vand.u32 127, %v737_v36 }
  0xdc   : > { %v743_v43 = vadd.s32 4294967288, %v738_v39  ;;  %v764_v46 = vadd.s32 4294967264, %v738_v39  ;;  %v771_v47 = vadd.s32 4294967256, %v738_v39  ;;  %v778_v48 = vadd.s32 4294967248, %v738_v39 }
  0xdd   : > { %454 = vadd.xlane.f32.xlu1 %v453_v44  ;;  %v750_v44 = vadd.s32 4294967280, %v738_v39  ;;  %v785_v49 = vadd.s32 4294967240, %v738_v39  ;;  %v2662_v52 = vsub.s32 %v738_v39, %v2655_v41  ;;  %v799_v53 = vadd.s32 4294967224, %v738_v39 }
  0xde   : > { %589 = vadd.xlane.f32.xlu0 %v588_v45  ;;  %v757_v45 = vadd.s32 4294967272, %v738_v39  ;;  %v806_v54 = vadd.s32 4294967216, %v738_v39  ;;  %v820_v59 = vadd.s32 4294967200, %v738_v39  ;;  %v2676_v61 = vsub.s32 %v764_v46, %v2655_v41 }
  0xdf   : > { %v2670_v58 = vsub.s32 %v750_v44, %v2655_v41  ;;  %v2685_v1 = vsub.s32 %v785_v49, %v2655_v41  ;;  %v834_v44 = vadd.s32 4294967184, %v738_v39  ;;  %v2694_v46 = vsub.s32 %v799_v53, %v2655_v41 }
  0xe0   : > { %v2673_v60 = vsub.s32 %v757_v45, %v2655_v41 }
  0xe1   : > { %547 = vadd.xlane.f32.xlu1 %v546_v50  ;;  %v792_v50 = vadd.s32 4294967232, %v738_v39 }
  0xe2   : > { %502 = vadd.xlane.f32.xlu0 %v501_v51 }
  0xe3   : > { %v2688_v3 = vsub.s32 %v792_v50, %v2655_v41 }
  0xe5   : > { %550 = vadd.xlane.f32.xlu1 %v549_v56  ;;  %v813_v56 = vadd.s32 4294967208, %v738_v39 }
  0xe6   : > { %592 = vadd.xlane.f32.xlu0 %v591_v57  ;;  %v2667_v57 = vsub.s32 %v743_v43, %v2655_v41  ;;  %v827_v43 = vadd.s32 4294967192, %v738_v39 }
  0xe9   : > { %598 = vadd.xlane.f32.xlu1 %v597_v62  ;;  %v2679_v62 = vsub.s32 %v771_v47, %v2655_v41  ;;  %v2697_v47 = vsub.s32 %v806_v54, %v2655_v41 }
  0xea   : > { %595 = vadd.xlane.f32.xlu0 %v594_v63  ;;  %v2682_v63 = vsub.s32 %v778_v48, %v2655_v41  ;;  %v2700_v48 = vsub.s32 %v813_v56, %v2655_v41 }
  0xeb   : > { %3300 = vst [vmem:[#allocation13_spill] sm:$0xff] %v2697_v47 }
  0xec   : > { %3301 = vst [vmem:[#allocation14_spill] sm:$0xff] %v2700_v48 }
  0xfa   : > { %v2581_v0 = vpop.xlane.xlu1 %457 }
  0xfb   : > { %v2583_v2 = vpop.xlane.xlu0 %409  ;;  %v617_v50 = vmul.f32 0.00390625, %v2581_v0 }
  0xfc   : > { %v601_v48 = vmul.f32 0.00390625, %v2583_v2 }
  0xfd   : > { %v851_v2 = vrot.slane %v617_v50, %v2662_v52 }
  0xfe   : > { %v2585_v4 = vpop.xlane.xlu1 %460 }
  0xff   : > { %v2587_v5 = vpop.xlane.xlu0 %412  ;;  %v618_v45 = vmul.f32 0.00390625, %v2585_v4  ;;  %v2708_v4 = vsub.s32 %v820_v59, %v2655_v41 }
 0x101   : > { %3303 = vst [vmem:[#allocation16_spill] sm:$0xff] %v2708_v4 }
 0x102   : > { %v2589_v6 = vpop.xlane.xlu1 %463 }
 0x103   : > { %v2591_v7 = vpop.xlane.xlu0 %415 }
 0x104   : > { %v603_v53 = vmul.f32 0.00390625, %v2591_v7  ;;  %v855_v7 = vrot.slane %v618_v45, %v2667_v57 }
 0x106   : > { %v2593_v8 = vpop.xlane.xlu1 %508 }
 0x107   : > { %v2595_v9 = vpop.xlane.xlu0 %505  ;;  %v634_v54 = vmul.f32 0.00390625, %v2593_v8 }
 0x108   : > { %v633_v47 = vmul.f32 0.00390625, %v2595_v9 }
 0x10a   : > { %v2597_v10 = vpop.xlane.xlu1 %466  ;;  %v930_v45 = vrot.slane %v633_v47, %v2662_v52 }
 0x10b   : > { %v2599_v11 = vpop.xlane.xlu0 %418  ;;  %v620_v56 = vmul.f32 0.00390625, %v2597_v10  ;;  %v841_v10 = vadd.s32 4294967176, %v738_v39 }
 0x10c   : > { %v604_v0 = vmul.f32 0.00390625, %v2599_v11 }
 0x10e   : > { %v2601_v12 = vpop.xlane.xlu1 %553  ;;  %v761_v39 = vrot.slane %v604_v0, %v2673_v60 }
 0x10f   : > { %v2603_v13 = vpop.xlane.xlu0 %511  ;;  %v649_v50 = vmul.f32 0.00390625, %v2601_v12 }
 0x110   : > { %v635_v8 = vmul.f32 0.00390625, %v2603_v13  ;;  %v865_v13 = vrot.slane %v620_v56, %v2673_v60 }
 0x112   : > { %v2605_v14 = vpop.xlane.xlu1 %421 }
 0x113   : > { %v2607_v15 = vpop.xlane.xlu0 %556  ;;  %v605_v9 = vmul.f32 0.00390625, %v2605_v14  ;;  %v742_v14 = vrot.slane %v601_v48, %v2662_v52 }
 0x116   : > { %v2609_v16 = vpop.xlane.xlu1 %514 }
 0x117   : > { %v2611_v17 = vpop.xlane.xlu0 %469 }
 0x118   : > { %v621_v47 = vmul.f32 0.00390625, %v2611_v17 }
 0x11a   : > { %v2613_v18 = vpop.xlane.xlu1 %424 }
 0x11b   : > { %v2615_v19 = vpop.xlane.xlu0 %559 }
 0x11e   : > { %v2617_v20 = vpop.xlane.xlu1 %517 }
 0x11f   : > { %v2619_v21 = vpop.xlane.xlu0 %472 }
 0x122   : > { %v2621_v22 = vpop.xlane.xlu1 %427 }
 0x123   : > { %v2623_v23 = vpop.xlane.xlu0 %562 }
 0x126   : > { %v2625_v24 = vpop.xlane.xlu1 %520 }
 0x127   : > { %v2627_v25 = vpop.xlane.xlu0 %475 }
 0x12a   : > { %v2629_v26 = vpop.xlane.xlu1 %430 }
 0x12b   : > { %v2631_v27 = vpop.xlane.xlu0 %565 }
 0x12e   : > { %v2633_v28 = vpop.xlane.xlu1 %523 }
 0x12f   : > { %v2635_v29 = vpop.xlane.xlu0 %478 }
 0x132   : > { %v2637_v30 = vpop.xlane.xlu1 %433 }
 0x133   : > { %v2639_v31 = vpop.xlane.xlu0 %568 }
 0x136   : > { %v2641_v32 = vpop.xlane.xlu1 %526 }
 0x137   : > { %v2643_v33 = vpop.xlane.xlu0 %481 }
 0x13a   : > { %v2645_v34 = vpop.xlane.xlu1 %436 }
 0x13b   : > { %v2647_v35 = vpop.xlane.xlu0 %571 }
 0x13e   : > { %v2649_v37 = vpop.xlane.xlu1 %529 }
 0x13f   : > { %v2651_v38 = vpop.xlane.xlu0 %484 }
 0x142   : > { %v2653_v40 = vpop.xlane.xlu1 %439 }
 0x143   : > { %v2657_v42 = vpop.xlane.xlu0 %574 }
 0x146   : > { %v2659_v51 = vpop.xlane.xlu1 %532 }
 0x147   : > { %v2664_v55 = vpop.xlane.xlu0 %487 }
 0x148   : > { %3298 = vst [vmem:[#allocation11_spill] sm:$0xff] %v2664_v55  ;;  %v602_v55 = vmul.f32 0.00390625, %v2587_v5  ;;  %v2719_v5 = vsub.s32 %v827_v43, %v2655_v41  ;;  %v650_v43 = vmul.f32 0.00390625, %v2607_v15  ;;  %v856_v15 = vsel %vm748_vm1, %v855_v7, %v851_v2 }
 0x149   : > { %v1009_v2 = vrot.slane %v649_v50, %v2662_v52  ;;  %v622_v52 = vmul.f32 0.00390625, %v2619_v21  ;;  %v608_v50 = vmul.f32 0.00390625, %v2629_v26  ;;  %v639_v21 = vmul.f32 0.00390625, %v2633_v28 }
 0x14a   : > { %v2690_v36 = vpop.xlane.xlu1 %442  ;;  %3304 = vst [vmem:[#allocation17_spill] sm:$0xff] %v2719_v5  ;;  %v747_v11 = vrot.slane %v602_v55, %v2667_v57  ;;  %v636_v55 = vmul.f32 0.00390625, %v2609_v16  ;;  %v1013_v12 = vrot.slane %v650_v43, %v2667_v57  ;;  %v2753_v16 = vsub.s32 %v841_v10, %v2655_v41 }
 0x14b   : > { %3299 = vst [vmem:[#allocation12_spill] sm:$0xff] %v2690_v36  ;;  %v2702_v49 = vpop.xlane.xlu0 %577  ;;  %v619_v36 = vmul.f32 0.00390625, %v2589_v6  ;;  %v2722_v6 = vsub.s32 %v834_v44, %v2655_v41  ;;  %v754_v44 = vrot.slane %v603_v53, %v2670_v58  ;;  %v939_v53 = vrot.slane %v635_v8, %v2670_v58 }
 0x14c   : > { %3302 = vst [vmem:[#allocation15_spill] sm:$0xff] %v2702_v49  ;;  %v749_v48 = vsel %vm748_vm1, %v747_v11, %v742_v14  ;;  %v870_v43 = vrot.slane %v621_v47, %v2676_v61  ;;  %v638_v14 = vmul.f32 0.00390625, %v2625_v24  ;;  %v624_v24 = vmul.f32 0.00390625, %v2635_v29 }
 0x14d   : > { %3305 = vst [vmem:[#allocation18_spill] sm:$0xff] %v2722_v6  ;;  %v860_v4 = vrot.slane %v619_v36, %v2670_v58  ;;  %v934_v6 = vrot.slane %v634_v54, %v2667_v57  ;;  %v768_v54 = vrot.slane %v605_v9, %v2676_v61  ;;  %v756_v5 = vsel %vm755_vm2, %v754_v44, %v749_v48 }
 0x14e   : > { %v2716_v49 = vpop.xlane.xlu1 %535  ;;  %v606_v9 = vmul.f32 0.00390625, %v2613_v18  ;;  %v763_v17 = vsel %vm762_vm3, %v761_v39, %v756_v5  ;;  %v651_v57 = vmul.f32 0.00390625, %v2615_v19  ;;  %v637_v18 = vmul.f32 0.00390625, %v2617_v20 }
 0x14f   : > { %v2727_v59 = vpop.xlane.xlu0 %490  ;;  %v861_v0 = vsel %vm755_vm2, %v860_v4, %v856_v15  ;;  %v935_v7 = vsel %vm748_vm1, %v934_v6, %v930_v45  ;;  %v944_v4 = vrot.slane %v636_v55, %v2673_v60  ;;  %v770_v6 = vsel %vm769_vm4, %v768_v54, %v763_v17 }
 0x150   : > { %v866_v8 = vsel %vm762_vm3, %v865_v13, %v861_v0  ;;  %v940_v11 = vsel %vm755_vm2, %v939_v53, %v935_v7  ;;  %v1014_v5 = vsel %vm748_vm1, %v1013_v12, %v1009_v2  ;;  %v607_v45 = vmul.f32 0.00390625, %v2621_v22 }
 0x151   : > { %v652_v19 = vmul.f32 0.00390625, %v2623_v23  ;;  %v775_v13 = vrot.slane %v606_v9, %v2679_v62  ;;  %v623_v39 = vmul.f32 0.00390625, %v2627_v25  ;;  %v945_v20 = vsel %vm762_vm3, %v944_v4, %v940_v11 }
 0x152   : > { %v2741_v36 = vpop.xlane.xlu1 %445  ;;  %v1018_v55 = vrot.slane %v651_v57, %v2670_v58  ;;  %v653_v15 = vmul.f32 0.00390625, %v2631_v27  ;;  %v871_v23 = vsel %vm769_vm4, %v870_v43, %v866_v8  ;;  %v949_v53 = vrot.slane %v637_v18, %v2676_v61 }
 0x153   : > { %v2747_v56 = vpop.xlane.xlu0 %580  ;;  %v609_v25 = vmul.f32 0.00390625, %v2637_v30  ;;  %v875_v26 = vrot.slane %v622_v52, %v2679_v62  ;;  %v782_v58 = vrot.slane %v607_v45, %v2682_v63  ;;  %v1023_v27 = vrot.slane %v652_v19, %v2673_v60 }
 0x154   : > { %v654_v28 = vmul.f32 0.00390625, %v2639_v31  ;;  %v777_v47 = vsel %vm776_vm5, %v775_v13, %v770_v6  ;;  %v954_v48 = vrot.slane %v638_v14, %v2679_v62  ;;  %v880_v0 = vrot.slane %v623_v39, %v2682_v63 }
 0x155   : > { %v789_v29 = vrot.slane %v608_v50, %v2685_v1  ;;  %v1019_v30 = vsel %vm755_vm2, %v1018_v55, %v1014_v5  ;;  %v1028_v12 = vrot.slane %v653_v15, %v2676_v61  ;;  %v959_v7 = vrot.slane %v639_v21, %v2682_v63 }
 0x156   : > { %v2763_v10 = vpop.xlane.xlu1 %538  ;;  %v640_v8 = vmul.f32 0.00390625, %v2641_v32  ;;  %v950_v31 = vsel %vm769_vm4, %v949_v53, %v945_v20  ;;  %v885_v9 = vrot.slane %v624_v24, %v2685_v1  ;;  %v796_v17 = vrot.slane %v609_v25, %v2688_v3  ;;  %v3306_v53 = vld [vmem:[#allocation11_spill] sm:$0xff]  ;;  %v3307_v25 = vld [vmem:[#allocation12_spill] sm:$0xff] }
 0x157   : > { %v2769_v44 = vpop.xlane.xlu0 %493  ;;  %v625_v2 = vmul.f32 0.00390625, %v2643_v33  ;;  %v876_v57 = vsel %vm776_vm5, %v875_v26, %v871_v23  ;;  %v784_v61 = vsel %vm783_vm6, %v782_v58, %v777_v47  ;;  %v1024_v11 = vsel %vm762_vm3, %v1023_v27, %v1019_v30  ;;  %v3308_v27 = vld [vmem:[#allocation15_spill] sm:$0xff]  ;;  %v3309_v30 = vld [vmem:[#allocation13_spill] sm:$0xff] }
 0x158   : > { %v1033_v32 = vrot.slane %v654_v28, %v2679_v62  ;;  %v955_v6 = vsel %vm776_vm5, %v954_v48, %v950_v31  ;;  %v881_v43 = vsel %vm783_vm6, %v880_v0, %v876_v57  ;;  %v791_v18 = vsel %vm790_vm7, %v789_v29, %v784_v61 }
 0x159   : > { %v610_v5 = vmul.f32 0.00390625, %v2645_v34  ;;  %v1029_v33 = vsel %vm769_vm4, %v1028_v12, %v1024_v11  ;;  %v960_v52 = vsel %vm783_vm6, %v959_v7, %v955_v6  ;;  %v964_v45 = vrot.slane %v640_v8, %v2685_v1  ;;  %v3311_v11 = vld [vmem:[#allocation16_spill] sm:$0xff] }
 0x15a   : > { %v2783_v22 = vpop.xlane.xlu1 %448  ;;  %v655_v19 = vmul.f32 0.00390625, %v2647_v35  ;;  %v886_v62 = vsel %vm790_vm7, %v885_v9, %v881_v43  ;;  %v798_v14 = vsel %vm797_vm8, %v796_v17, %v791_v18  ;;  %v890_v39 = vrot.slane %v625_v2, %v2688_v3  ;;  %v3310_v9 = vld [vmem:[#allocation14_spill] sm:$0xff] }
 0x15b   : > { %v2789_v54 = vpop.xlane.xlu0 %583  ;;  %v641_v34 = vmul.f32 0.00390625, %v2649_v37  ;;  %v1034_v20 = vsel %vm776_vm5, %v1033_v32, %v1029_v33  ;;  %v626_v55 = vmul.f32 0.00390625, %v2651_v38  ;;  %v611_v15 = vmul.f32 0.00390625, %v2653_v40 }
 0x15c   : > { %v656_v35 = vmul.f32 0.00390625, %v2657_v42  ;;  %v803_v21 = vrot.slane %v610_v5, %v2694_v46  ;;  %v642_v23 = vmul.f32 0.00390625, %v2659_v51  ;;  %v627_v24 = vmul.f32 0.00390625, %v3306_v53 }
 0x15d   : > { %v612_v26 = vmul.f32 0.00390625, %v3307_v25  ;;  %v965_v37 = vsel %vm790_vm7, %v964_v45, %v960_v52  ;;  %v1038_v58 = vrot.slane %v655_v19, %v2682_v63  ;;  %v657_v28 = vmul.f32 0.00390625, %v3308_v27 }
 0x15e   : > { %v2803_v60 = vpop.xlane.xlu1 %541  ;;  %v643_v38 = vmul.f32 0.00390625, %v2716_v49  ;;  %v891_v42 = vsel %vm797_vm8, %v890_v39, %v886_v62  ;;  %v969_v47 = vrot.slane %v641_v34, %v2688_v3  ;;  %v628_v48 = vmul.f32 0.00390625, %v2727_v59 }
 0x15f   : > { %v2809_v4 = vpop.xlane.xlu0 %496  ;;  %v613_v51 = vmul.f32 0.00390625, %v2741_v36  ;;  %v895_v29 = vrot.slane %v626_v55, %v2694_v46  ;;  %v810_v12 = vrot.slane %v611_v15, %v3309_v30  ;;  %v1043_v63 = vrot.slane %v656_v35, %v2685_v1 }
 0x160   : > { %v658_v7 = vmul.f32 0.00390625, %v2747_v56  ;;  %v805_v49 = vsel %vm804_vm9, %v803_v21, %v798_v14  ;;  %v974_v8 = vrot.slane %v642_v23, %v2694_v46  ;;  %v900_v31 = vrot.slane %v627_v24, %v3309_v30  ;;  %v3312_v24 = vld [vmem:[#allocation17_spill] sm:$0xff] }
 0x161   : > { %v817_v17 = vrot.slane %v612_v26, %v3310_v9  ;;  %v1039_v59 = vsel %vm783_vm6, %v1038_v58, %v1034_v20  ;;  %v1048_v36 = vrot.slane %v657_v28, %v2688_v3  ;;  %v979_v2 = vrot.slane %v643_v38, %v3309_v30 }
 0x162   : > { %v2823_v13 = vpop.xlane.xlu1 %451  ;;  %v644_v57 = vmul.f32 0.00390625, %v2763_v10  ;;  %v970_v56 = vsel %vm797_vm8, %v969_v47, %v965_v37  ;;  %v905_v61 = vrot.slane %v628_v48, %v3310_v9  ;;  %v824_v32 = vrot.slane %v613_v51, %v3311_v11 }
 0x163   : > { %v2829_v50 = vpop.xlane.xlu0 %586  ;;  %v629_v6 = vmul.f32 0.00390625, %v2769_v44  ;;  %v896_v18 = vsel %vm804_vm9, %v895_v29, %v891_v42  ;;  %v812_v5 = vsel %vm811_vm10, %v810_v12, %v805_v49  ;;  %v1044_v3 = vsel %vm790_vm7, %v1043_v63, %v1039_v59 }
 0x164   : > { %v1053_v33 = vrot.slane %v658_v7, %v2694_v46  ;;  %v975_v10 = vsel %vm804_vm9, %v974_v8, %v970_v56  ;;  %v901_v52 = vsel %vm811_vm10, %v900_v31, %v896_v18  ;;  %v819_v45 = vsel %vm818_vm11, %v817_v17, %v812_v5 }
 0x165   : > { %v614_v19 = vmul.f32 0.00390625, %v2783_v22  ;;  %v1049_v62 = vsel %vm797_vm8, %v1048_v36, %v1044_v3  ;;  %v980_v44 = vsel %vm811_vm10, %v979_v2, %v975_v10  ;;  %v984_v14 = vrot.slane %v644_v57, %v3310_v9 }
 0x166   : > { %v545_v40 = vpop.xlane.xlu1 %544  ;;  %v645_v39 = vmul.f32 0.00390625, %v2803_v60  ;;  %v906_v20 = vsel %vm818_vm11, %v905_v61, %v901_v52  ;;  %v826_v46 = vsel %vm825_vm12, %v824_v32, %v819_v45  ;;  %v910_v55 = vrot.slane %v629_v6, %v3311_v11 }
 0x167   : > { %v500_v0 = vpop.xlane.xlu0 %499  ;;  %v630_v15 = vmul.f32 0.00390625, %v2809_v4  ;;  %v1054_v22 = vsel %vm804_vm9, %v1053_v33, %v1049_v62  ;;  %v659_v21 = vmul.f32 0.00390625, %v2789_v54  ;;  %v646_v23 = vmul.f32 0.00390625, %v545_v40 }
 0x168   : > { %v631_v53 = vmul.f32 0.00390625, %v500_v0  ;;  %v831_v60 = vrot.slane %v614_v19, %v3312_v24  ;;  %v660_v25 = vmul.f32 0.00390625, %v2829_v50  ;;  %v985_v58 = vsel %vm818_vm11, %v984_v14, %v980_v44  ;;  %v3313_v0 = vld [vmem:[#allocation18_spill] sm:$0xff] }
 0x169   : > { %v989_v4 = vrot.slane %v645_v39, %v3311_v11  ;;  %v615_v27 = vmul.f32 0.00390625, %v2823_v13  ;;  %vm1087_vm1 = vcmask 1042434   ;;  %v911_v54 = vsel %vm825_vm12, %v910_v55, %v906_v20  ;;  %v1901_v20 = vld [vmem:[%s3275_s2] ss:$0 sm:$0xff] }
 0x16a   : > { %v455_v1 = vpop.xlane.xlu1 %454  ;;  %v915_v40 = vrot.slane %v630_v15, %v3312_v24  ;;  %v1058_v50 = vrot.slane %v659_v21, %v3309_v30  ;;  %v994_v51 = vrot.slane %v646_v23, %v3312_v24  ;;  %v920_v29 = vrot.slane %v631_v53, %v3313_v0 }
 0x16b   : > { %v590_v43 = vpop.xlane.xlu0 %589  ;;  %v616_v42 = vmul.f32 0.00390625, %v455_v1  ;;  %v833_v63 = vsel %vm832_vm13, %v831_v60, %v826_v46  ;;  %v1063_v13 = vrot.slane %v660_v25, %v3310_v9  ;;  %v990_v8 = vsel %vm825_vm12, %v989_v4, %v985_v58 }
 0x16c   : > { %v661_v28 = vmul.f32 0.00390625, %v590_v43  ;;  %v838_v31 = vrot.slane %v615_v27, %v3313_v0  ;;  %v916_v36 = vsel %vm832_vm13, %v915_v40, %v911_v54  ;;  %v1059_v56 = vsel %vm811_vm10, %v1058_v50, %v1054_v22  ;;  %v1902_v22 = vld [vmem:[%s3277_s4] ss:$0 sm:$0xff]  ;;  %v2005_v50 = vld [vmem:[%s2443_s9 + $0x18] sm:$0xff] }
 0x16d   : > { %v845_v2 = vrot.slane %v616_v42, %v2753_v16  ;;  %v995_v61 = vsel %vm832_vm13, %v994_v51, %v990_v8  ;;  %v921_v32 = vsel %vm839_vm14, %v920_v29, %v916_v36  ;;  %vm1089_vm2 = vcmask 1043459   ;;  %v2011_v36 = vld [vmem:[%s2443_s9 + $0x48] sm:$0xff] }
 0x16e   : > { %v548_v34 = vpop.xlane.xlu1 %547  ;;  %v1068_v17 = vrot.slane %v661_v28, %v3311_v11  ;;  %v1064_v11 = vsel %vm818_vm11, %v1063_v13, %v1059_v56  ;;  %v840_v3 = vsel %vm839_vm14, %v838_v31, %v833_v63  ;;  %vm1171_vm3 = vcmask 64512   ;;  %v2009_v31 = vld [vmem:[%s2443_s9 + $0x28] sm:$0xff] }
 0x16f   : > { %v503_v35 = vpop.xlane.xlu0 %502  ;;  %v647_v26 = vmul.f32 0.00390625, %v548_v34  ;;  %v847_v45 = vsel %vm846_vm15, %v845_v2, %v840_v3  ;;  %v1163_v34 = vld [vmem:[%s3276_s3] sm:$0xff]  ;;  %v1320_v4 = vsub.s32 1, %v2655_v41  ;;  %v1387_v28 = vsub.s32 2, %v2655_v41 }
 0x170   : > { %v632_v37 = vmul.f32 0.00390625, %v503_v35  ;;  %v1069_v33 = vsel %vm825_vm12, %v1068_v17, %v1064_v11  ;;  %1940 = vmatpush3.msra.mxu1 %v1163_v34  ;;  %v1454_v54 = vsub.s32 3, %v2655_v41  ;;  %v2020_v34 = vld [vmem:[%s2443_s9 + $0x70] sm:$0xff] }
 0x171   : > { %v999_v7 = vrot.slane %v647_v26, %v3313_v0  ;;  %v1253_v26 = vsub.s32 0, %v2655_v41 }
 0x172   : > { %v551_v38 = vpop.xlane.xlu1 %550  ;;  %v925_v49 = vrot.slane %v632_v37, %v2753_v16 }
 0x173   : > { %v648_v47 = vmul.f32 0.00390625, %v551_v38  ;;  %v593_v48 = vpop.xlane.xlu0 %592  ;;  %v1000_v43 = vsel %vm839_vm14, %v999_v7, %v995_v61  ;;  %v2013_v61 = vld [vmem:[%s2443_s9 + $0x38] sm:$0xff] }
 0x174   : > { %v662_v12 = vmul.f32 0.00390625, %v593_v48  ;;  %v926_v18 = vsel %vm846_vm15, %v925_v49, %v921_v32  ;;  %v2008_v49 = vld [vmem:[%s2443_s9 + $0x20] sm:$0xff] }
 0x175   : > { %v1004_v30 = vrot.slane %v648_v47, %v2753_v16  ;;  %v1086_v44 = vsel %vm1085_vm0, %v926_v18, %v847_v45  ;;  %v2004_v47 = vld [vmem:[%s2443_s9 + $0x10] sm:$0xff] }
 0x176   : > { %v599_v59 = vpop.xlane.xlu1 %598  ;;  %v1073_v57 = vrot.slane %v662_v12, %v3312_v24  ;;  %v2007_v12 = vld [vmem:[%s2443_s9 + $0x8] sm:$0xff] }
 0x177   : > { %v596_v9 = vpop.xlane.xlu0 %595  ;;  %v664_v1 = vmul.f32 0.00390625, %v599_v59  ;;  %v1005_v52 = vsel %vm846_vm15, %v1004_v30, %v1000_v43  ;;  %v2010_v30 = vld [vmem:[%s2443_s9 + $0x40] sm:$0xff]  ;;  %v2015_v43 = vld [vmem:[%s2443_s9 + $0x68] sm:$0xff] }
 0x178   : > { %v663_v6 = vmul.f32 0.00390625, %v596_v9  ;;  %v1074_v19 = vsel %vm832_vm13, %v1073_v57, %v1069_v33  ;;  %v2016_v33 = vld [vmem:[%s2443_s9 + $0x50] sm:$0xff] }
 0x179   : > { %v1083_v5 = vrot.slane %v664_v1, %v2753_v16  ;;  %v1088_v16 = vsel %vm1087_vm1, %v1005_v52, %v1086_v44  ;;  %v2012_v1 = vld [vmem:[%s2443_s9 + $0x30] sm:$0xff]  ;;  %v2017_v52 = vld [vmem:[%s2443_s9 + $0x58] sm:$0xff]  ;;  %v2019_v44 = vld [vmem:[%s2443_s9 + $0x88] sm:$0xff] }
 0x17a   : > { %v1078_v10 = vrot.slane %v663_v6, %v3313_v0  ;;  %v2006_v0 = vld [vmem:[%s2443_s9] sm:$0xff] }
 0x17b   : > { %v2014_v6 = vld [vmem:[%s2443_s9 + $0x60] sm:$0xff] }
 0x17c   : > { %v1079_v62 = vsel %vm839_vm14, %v1078_v10, %v1074_v19  ;;  %v2018_v19 = vld [vmem:[%s2443_s9 + $0x80] sm:$0xff] }
 0x17d   : > { %v1084_v14 = vsel %vm846_vm15, %v1083_v5, %v1079_v62 }
 0x17e   : > { %v1090_v39 = vsel %vm1089_vm2, %v1084_v14, %v1088_v16 }
 0x17f   : > { %1937 = vmatmul.mubr.f32.vlgmr.msra.gmra.mrb[0].mxu0 %v1090_v39 }
 0x252   : > { %v1158_v46 = vpop.f32.mrb[0].mxu0 }
 0x253   : > { %v1159_v55 = vadd.f32 %v1901_v20, %v1158_v46  ;;  %v1938_v15 = vpop.f32.mrb[1].mxu0  ;;  %v2021_v46 = vld [vmem:[%s2443_s9 + $0x78] sm:$0xff] }
 0x254   : > { %v2022_v15 = vld [vmem:[%s2443_s9 + $0xa0] sm:$0xff] }
 0x255   : > { %v1162_v35 = vmax.f32 %v1159_v55, 0.0 }
 0x257   : > { %1942 = vmatmul.mubr.msk.f32.vlgmr.msra.gmra.mrb[0].mxu1 %vm1171_vm3, %v1162_v35 }
 0x32a   : > { %v1241_v21 = vpop.f32.mrb[0].mxu1 }
 0x32b   : > { %v1242_v23 = vadd.f32 %v1902_v22, %v1241_v21  ;;  %v1943_v53 = vpop.f32.mrb[1].mxu1  ;;  %v2023_v22 = vld [vmem:[%s2443_s9 + $0xa8] sm:$0xff] }
 0x32d   : > { %v1904_v24 = vmul.f32 -1.442695, %v1242_v23 }
 0x32f   : > { %2000 = vpow2.f32 %v1904_v24  ;;  %v2024_v24 = vld [vmem:[%s2443_s9 + $0x90] sm:$0xff] }
 0x339   : > { %v2001_v60 = vpop.eup %2000 }
 0x33a   : > { %v1248_v25 = vadd.f32 1.0, %v2001_v60 }
 0x33c   : > { %2002 = vrcp.f32 %v1248_v25  ;;  %v2025_v25 = vld [vmem:[%s2443_s9 + $0x98] sm:$0xff] }
 0x346   : > { %v2003_v37 = vpop.eup %2002 }
 0x347   : > { %v1254_v58 = vrot.slane %v2003_v37, %v1253_v26  ;;  %v1321_v27 = vrot.slane %v2003_v37, %v1320_v4  ;;  %v1388_v38 = vrot.slane %v2003_v37, %v1387_v28  ;;  %v2932_v40 = vrot.slane %v2003_v37, %v1454_v54  ;;  %v2026_v37 = vld [vmem:[%s2443_s9 + $0xc0] sm:$0xff]  ;;  %v2027_v4 = vld [vmem:[%s2443_s9 + $0xc8] sm:$0xff]  ;;  %v2028_v54 = vld [vmem:[%s2443_s9 + $0xb0] sm:$0xff] }
 0x349   : > { %1260 = vbcast.lane.b32.xlu1 %v1254_v58, 264  ;;  %1256 = vbcast.lane.b32.xlu0 %v1254_v58, 256 }
 0x34d   : > { %1264 = vbcast.lane.b32.xlu1 %v1254_v58, 272  ;;  %1272 = vbcast.lane.b32.xlu0 %v1254_v58, 288 }
 0x351   : > { %1268 = vbcast.lane.b32.xlu1 %v1254_v58, 280  ;;  %1280 = vbcast.lane.b32.xlu0 %v1254_v58, 304 }
 0x355   : > { %1276 = vbcast.lane.b32.xlu1 %v1254_v58, 296  ;;  %1288 = vbcast.lane.b32.xlu0 %v1254_v58, 320 }
 0x359   : > { %1284 = vbcast.lane.b32.xlu1 %v1254_v58, 312  ;;  %1296 = vbcast.lane.b32.xlu0 %v1254_v58, 336 }
 0x35d   : > { %1292 = vbcast.lane.b32.xlu1 %v1254_v58, 328  ;;  %1304 = vbcast.lane.b32.xlu0 %v1254_v58, 352 }
 0x361   : > { %1300 = vbcast.lane.b32.xlu1 %v1254_v58, 344  ;;  %1312 = vbcast.lane.b32.xlu0 %v1254_v58, 368 }
 0x365   : > { %1308 = vbcast.lane.b32.xlu1 %v1254_v58, 360  ;;  %1323 = vbcast.lane.b32.xlu0 %v1321_v27, 256 }
 0x369   : > { %1316 = vbcast.lane.b32.xlu1 %v1254_v58, 376  ;;  %1331 = vbcast.lane.b32.xlu0 %v1321_v27, 272 }
 0x36d   : > { %1327 = vbcast.lane.b32.xlu1 %v1321_v27, 264  ;;  %1339 = vbcast.lane.b32.xlu0 %v1321_v27, 288 }
 0x371   : > { %1335 = vbcast.lane.b32.xlu1 %v1321_v27, 280  ;;  %1347 = vbcast.lane.b32.xlu0 %v1321_v27, 304 }
 0x375   : > { %1343 = vbcast.lane.b32.xlu1 %v1321_v27, 296  ;;  %1355 = vbcast.lane.b32.xlu0 %v1321_v27, 320 }
 0x379   : > { %1351 = vbcast.lane.b32.xlu1 %v1321_v27, 312  ;;  %1363 = vbcast.lane.b32.xlu0 %v1321_v27, 336 }
 0x37d   : > { %1359 = vbcast.lane.b32.xlu1 %v1321_v27, 328  ;;  %1371 = vbcast.lane.b32.xlu0 %v1321_v27, 352 }
 0x381   : > { %1367 = vbcast.lane.b32.xlu1 %v1321_v27, 344  ;;  %1379 = vbcast.lane.b32.xlu0 %v1321_v27, 368 }
 0x385   : > { %1375 = vbcast.lane.b32.xlu1 %v1321_v27, 360  ;;  %1390 = vbcast.lane.b32.xlu0 %v1388_v38, 256 }
 0x389   : > { %1383 = vbcast.lane.b32.xlu1 %v1321_v27, 376  ;;  %1398 = vbcast.lane.b32.xlu0 %v1388_v38, 272 }
 0x38d   : > { %1394 = vbcast.lane.b32.xlu1 %v1388_v38, 264  ;;  %1406 = vbcast.lane.b32.xlu0 %v1388_v38, 288 }
 0x391   : > { %1402 = vbcast.lane.b32.xlu1 %v1388_v38, 280  ;;  %1414 = vbcast.lane.b32.xlu0 %v1388_v38, 304 }
 0x395   : > { %1410 = vbcast.lane.b32.xlu1 %v1388_v38, 296  ;;  %1422 = vbcast.lane.b32.xlu0 %v1388_v38, 320 }
 0x399   : > { %1418 = vbcast.lane.b32.xlu1 %v1388_v38, 312  ;;  %1430 = vbcast.lane.b32.xlu0 %v1388_v38, 336 }
 0x39d   : > { %1426 = vbcast.lane.b32.xlu1 %v1388_v38, 328  ;;  %1438 = vbcast.lane.b32.xlu0 %v1388_v38, 352 }
 0x3a1   : > { %1434 = vbcast.lane.b32.xlu1 %v1388_v38, 344  ;;  %1446 = vbcast.lane.b32.xlu0 %v1388_v38, 368 }
 0x3a5   : > { %1442 = vbcast.lane.b32.xlu1 %v1388_v38, 360  ;;  %1457 = vbcast.lane.b32.xlu0 %v2932_v40, 256 }
 0x3a9   : > { %1450 = vbcast.lane.b32.xlu1 %v1388_v38, 376  ;;  %1465 = vbcast.lane.b32.xlu0 %v2932_v40, 272 }
 0x3ad   : > { %1461 = vbcast.lane.b32.xlu1 %v2932_v40, 264  ;;  %1473 = vbcast.lane.b32.xlu0 %v2932_v40, 288 }
 0x3b1   : > { %1469 = vbcast.lane.b32.xlu1 %v2932_v40, 280  ;;  %1481 = vbcast.lane.b32.xlu0 %v2932_v40, 304 }
 0x3b5   : > { %1477 = vbcast.lane.b32.xlu1 %v2932_v40, 296  ;;  %1489 = vbcast.lane.b32.xlu0 %v2932_v40, 320 }
 0x3b9   : > { %1485 = vbcast.lane.b32.xlu1 %v2932_v40, 312  ;;  %1497 = vbcast.lane.b32.xlu0 %v2932_v40, 336 }
 0x3bb   : > { %v1261_v41 = vpop.permute.xlu1 %1260  ;;  %v1257_v42 = vpop.permute.xlu0 %1256 }
 0x3bc   : > { %v1521_v48 = vmul.f32 %v2004_v47, %v1261_v41  ;;  %v1522_v51 = vmul.f32 %v2005_v50, %v1261_v41  ;;  %v1519_v29 = vmul.f32 %v2006_v0, %v1257_v42  ;;  %v1520_v63 = vmul.f32 %v2007_v12, %v1257_v42  ;;  %v2029_v41 = vld [vmem:[%s2443_s9 + $0xb8] sm:$0xff]  ;;  %v2030_v47 = vld [vmem:[%s2443_s9 + $0xe0] sm:$0xff]  ;;  %v2031_v50 = vld [vmem:[%s2443_s9 + $0xe8] sm:$0xff] }
 0x3bd   : > { %1493 = vbcast.lane.b32.xlu1 %v2932_v40, 328  ;;  %1505 = vbcast.lane.b32.xlu0 %v2932_v40, 352  ;;  %v2032_v12 = vld [vmem:[%s2443_s9 + $0xd0] sm:$0xff] }
 0x3be   : > { %1649 = vst [vmem:[%s2952_s15 + $0x10] sm:$0xff] %v1521_v48  ;;  %1650 = vst [vmem:[%s2952_s15 + $0x18] sm:$0xff] %v1522_v51 }
 0x3bf   : > { %1647 = vst [vmem:[%s2952_s15] sm:$0xff] %v1519_v29  ;;  %1648 = vst [vmem:[%s2952_s15 + $0x8] sm:$0xff] %v1520_v63  ;;  %v1265_v13 = vpop.permute.xlu1 %1264  ;;  %v1273_v7 = vpop.permute.xlu0 %1272 }
 0x3c0   : > { %v1523_v8 = vmul.f32 %v2008_v49, %v1265_v13  ;;  %v1524_v17 = vmul.f32 %v2009_v31, %v1265_v13  ;;  %v1527_v59 = vmul.f32 %v2010_v30, %v1273_v7  ;;  %v1528_v2 = vmul.f32 %v2011_v36, %v1273_v7  ;;  %v2033_v13 = vld [vmem:[%s2443_s9 + $0xd8] sm:$0xff]  ;;  %v2034_v49 = vld [vmem:[%s2443_s9 + $0x100] sm:$0xff]  ;;  %v2035_v31 = vld [vmem:[%s2443_s9 + $0x108] sm:$0xff] }
 0x3c1   : > { %1501 = vbcast.lane.b32.xlu1 %v2932_v40, 344  ;;  %1513 = vbcast.lane.b32.xlu0 %v2932_v40, 368  ;;  %v2036_v36 = vld [vmem:[%s2443_s9 + $0xf0] sm:$0xff] }
 0x3c2   : > { %1651 = vst [vmem:[%s2952_s15 + $0x20] sm:$0xff] %v1523_v8  ;;  %1652 = vst [vmem:[%s2952_s15 + $0x28] sm:$0xff] %v1524_v17 }
 0x3c3   : > { %1655 = vst [vmem:[%s2952_s15 + $0x40] sm:$0xff] %v1527_v59  ;;  %1656 = vst [vmem:[%s2952_s15 + $0x48] sm:$0xff] %v1528_v2  ;;  %v1269_v57 = vpop.permute.xlu1 %1268  ;;  %v1281_v9 = vpop.permute.xlu0 %1280 }
 0x3c4   : > { %v1525_v56 = vmul.f32 %v2012_v1, %v1269_v57  ;;  %v1526_v32 = vmul.f32 %v2013_v61, %v1269_v57  ;;  %v1531_v11 = vmul.f32 %v2014_v6, %v1281_v9  ;;  %v1532_v18 = vmul.f32 %v2015_v43, %v1281_v9  ;;  %v2037_v57 = vld [vmem:[%s2443_s9 + $0xf8] sm:$0xff]  ;;  %v2038_v1 = vld [vmem:[%s2443_s9 + $0x120] sm:$0xff]  ;;  %v2039_v61 = vld [vmem:[%s2443_s9 + $0x128] sm:$0xff] }
 0x3c5   : > { %1509 = vbcast.lane.b32.xlu1 %v2932_v40, 360  ;;  %v2040_v43 = vld [vmem:[%s2443_s9 + $0x110] sm:$0xff] }
 0x3c6   : > { %1653 = vst [vmem:[%s2952_s15 + $0x30] sm:$0xff] %v1525_v56  ;;  %1654 = vst [vmem:[%s2952_s15 + $0x38] sm:$0xff] %v1526_v32 }
 0x3c7   : > { %1659 = vst [vmem:[%s2952_s15 + $0x60] sm:$0xff] %v1531_v11  ;;  %1660 = vst [vmem:[%s2952_s15 + $0x68] sm:$0xff] %v1532_v18  ;;  %v1277_v5 = vpop.permute.xlu1 %1276  ;;  %v1289_v3 = vpop.permute.xlu0 %1288 }
 0x3c8   : > { %v1529_v10 = vmul.f32 %v2016_v33, %v1277_v5  ;;  %v1530_v45 = vmul.f32 %v2017_v52, %v1277_v5  ;;  %v1535_v62 = vmul.f32 %v2018_v19, %v1289_v3  ;;  %v1536_v14 = vmul.f32 %v2019_v44, %v1289_v3  ;;  %v2041_v5 = vld [vmem:[%s2443_s9 + $0x118] sm:$0xff]  ;;  %v2042_v33 = vld [vmem:[%s2443_s9 + $0x140] sm:$0xff]  ;;  %v2043_v52 = vld [vmem:[%s2443_s9 + $0x148] sm:$0xff] }
 0x3c9   : > { %1517 = vbcast.lane.b32.xlu1 %v2932_v40, 376  ;;  %v2044_v44 = vld [vmem:[%s2443_s9 + $0x130] sm:$0xff] }
 0x3ca   : > { %1657 = vst [vmem:[%s2952_s15 + $0x50] sm:$0xff] %v1529_v10  ;;  %1658 = vst [vmem:[%s2952_s15 + $0x58] sm:$0xff] %v1530_v45 }
 0x3cb   : > { %1663 = vst [vmem:[%s2952_s15 + $0x80] sm:$0xff] %v1535_v62  ;;  %1664 = vst [vmem:[%s2952_s15 + $0x88] sm:$0xff] %v1536_v14  ;;  %v1285_v16 = vpop.permute.xlu1 %1284  ;;  %v1297_v39 = vpop.permute.xlu0 %1296 }
 0x3cc   : > { %v1533_v20 = vmul.f32 %v2020_v34, %v1285_v16  ;;  %v1534_v55 = vmul.f32 %v2021_v46, %v1285_v16  ;;  %v1539_v35 = vmul.f32 %v2022_v15, %v1297_v39  ;;  %v1540_v21 = vmul.f32 %v2023_v22, %v1297_v39  ;;  %v2045_v16 = vld [vmem:[%s2443_s9 + $0x138] sm:$0xff]  ;;  %v2046_v34 = vld [vmem:[%s2443_s9 + $0x160] sm:$0xff]  ;;  %v2047_v46 = vld [vmem:[%s2443_s9 + $0x168] sm:$0xff] }
 0x3cd   : > { %v2048_v22 = vld [vmem:[%s2443_s9 + $0x150] sm:$0xff] }
 0x3ce   : > { %1661 = vst [vmem:[%s2952_s15 + $0x70] sm:$0xff] %v1533_v20  ;;  %1662 = vst [vmem:[%s2952_s15 + $0x78] sm:$0xff] %v1534_v55 }
 0x3cf   : > { %1667 = vst [vmem:[%s2952_s15 + $0xa0] sm:$0xff] %v1539_v35  ;;  %1668 = vst [vmem:[%s2952_s15 + $0xa8] sm:$0xff] %v1540_v21  ;;  %v1293_v23 = vpop.permute.xlu1 %1292  ;;  %v1305_v53 = vpop.permute.xlu0 %1304 }
 0x3d0   : > { %v1537_v60 = vmul.f32 %v2024_v24, %v1293_v23  ;;  %v1538_v26 = vmul.f32 %v2025_v25, %v1293_v23  ;;  %v1543_v58 = vmul.f32 %v2026_v37, %v1305_v53  ;;  %v1544_v27 = vmul.f32 %v2027_v4, %v1305_v53  ;;  %v2049_v23 = vld [vmem:[%s2443_s9 + $0x158] sm:$0xff]  ;;  %v2050_v24 = vld [vmem:[%s2443_s9 + $0x180] sm:$0xff]  ;;  %v2051_v25 = vld [vmem:[%s2443_s9 + $0x188] sm:$0xff] }
 0x3d1   : > { %v2052_v4 = vld [vmem:[%s2443_s9 + $0x170] sm:$0xff] }
 0x3d2   : > { %1665 = vst [vmem:[%s2952_s15 + $0x90] sm:$0xff] %v1537_v60  ;;  %1666 = vst [vmem:[%s2952_s15 + $0x98] sm:$0xff] %v1538_v26 }
 0x3d3   : > { %1671 = vst [vmem:[%s2952_s15 + $0xc0] sm:$0xff] %v1543_v58  ;;  %1672 = vst [vmem:[%s2952_s15 + $0xc8] sm:$0xff] %v1544_v27  ;;  %v1301_v28 = vpop.permute.xlu1 %1300  ;;  %v1313_v38 = vpop.permute.xlu0 %1312 }
 0x3d4   : > { %v1541_v40 = vmul.f32 %v2028_v54, %v1301_v28  ;;  %v1542_v42 = vmul.f32 %v2029_v41, %v1301_v28  ;;  %v1547_v48 = vmul.f32 %v2030_v47, %v1313_v38  ;;  %v1548_v51 = vmul.f32 %v2031_v50, %v1313_v38  ;;  %v2053_v28 = vld [vmem:[%s2443_s9 + $0x178] sm:$0xff]  ;;  %v2054_v54 = vld [vmem:[%s2443_s9 + $0x1a0] sm:$0xff]  ;;  %v2055_v41 = vld [vmem:[%s2443_s9 + $0x1a8] sm:$0xff] }
 0x3d5   : > { %v2056_v50 = vld [vmem:[%s2443_s9 + $0x190] sm:$0xff] }
 0x3d6   : > { %1669 = vst [vmem:[%s2952_s15 + $0xb0] sm:$0xff] %v1541_v40  ;;  %1670 = vst [vmem:[%s2952_s15 + $0xb8] sm:$0xff] %v1542_v42 }
 0x3d7   : > { %1675 = vst [vmem:[%s2952_s15 + $0xe0] sm:$0xff] %v1547_v48  ;;  %1676 = vst [vmem:[%s2952_s15 + $0xe8] sm:$0xff] %v1548_v51  ;;  %v1309_v0 = vpop.permute.xlu1 %1308  ;;  %v1324_v29 = vpop.permute.xlu0 %1323 }
 0x3d8   : > { %v1545_v63 = vmul.f32 %v2032_v12, %v1309_v0  ;;  %v1546_v7 = vmul.f32 %v2033_v13, %v1309_v0  ;;  %v1551_v8 = vmul.f32 %v2034_v49, %v1324_v29  ;;  %v1552_v17 = vmul.f32 %v2035_v31, %v1324_v29  ;;  %v2057_v0 = vld [vmem:[%s2443_s9 + $0x198] sm:$0xff]  ;;  %v2058_v12 = vld [vmem:[%s2443_s9 + $0x1c0] sm:$0xff]  ;;  %v2059_v13 = vld [vmem:[%s2443_s9 + $0x1c8] sm:$0xff] }
 0x3d9   : > { %v2060_v31 = vld [vmem:[%s2443_s9 + $0x1b0] sm:$0xff] }
 0x3da   : > { %1673 = vst [vmem:[%s2952_s15 + $0xd0] sm:$0xff] %v1545_v63  ;;  %1674 = vst [vmem:[%s2952_s15 + $0xd8] sm:$0xff] %v1546_v7 }
 0x3db   : > { %1679 = vst [vmem:[%s2952_s15 + $0x100] sm:$0xff] %v1551_v8  ;;  %1680 = vst [vmem:[%s2952_s15 + $0x108] sm:$0xff] %v1552_v17  ;;  %v1317_v30 = vpop.permute.xlu1 %1316  ;;  %v1332_v59 = vpop.permute.xlu0 %1331 }
 0x3dc   : > { %v1549_v2 = vmul.f32 %v2036_v36, %v1317_v30  ;;  %v1550_v9 = vmul.f32 %v2037_v57, %v1317_v30  ;;  %v1555_v56 = vmul.f32 %v2038_v1, %v1332_v59  ;;  %v1556_v32 = vmul.f32 %v2039_v61, %v1332_v59  ;;  %v2061_v30 = vld [vmem:[%s2443_s9 + $0x1b8] sm:$0xff]  ;;  %v2062_v36 = vld [vmem:[%s2443_s9 + $0x1e0] sm:$0xff]  ;;  %v2063_v57 = vld [vmem:[%s2443_s9 + $0x1e8] sm:$0xff] }
 0x3dd   : > { %v2064_v61 = vld [vmem:[%s2443_s9 + $0x1d0] sm:$0xff] }
 0x3de   : > { %1677 = vst [vmem:[%s2952_s15 + $0xf0] sm:$0xff] %v1549_v2  ;;  %1678 = vst [vmem:[%s2952_s15 + $0xf8] sm:$0xff] %v1550_v9 }
 0x3df   : > { %1683 = vst [vmem:[%s2952_s15 + $0x120] sm:$0xff] %v1555_v56  ;;  %1684 = vst [vmem:[%s2952_s15 + $0x128] sm:$0xff] %v1556_v32  ;;  %v1328_v6 = vpop.permute.xlu1 %1327  ;;  %v1340_v11 = vpop.permute.xlu0 %1339 }
 0x3e0   : > { %v1553_v18 = vmul.f32 %v2040_v43, %v1328_v6  ;;  %v1554_v3 = vmul.f32 %v2041_v5, %v1328_v6  ;;  %v1559_v10 = vmul.f32 %v2042_v33, %v1340_v11  ;;  %v1560_v45 = vmul.f32 %v2043_v52, %v1340_v11  ;;  %v2065_v6 = vld [vmem:[%s2443_s9 + $0x1d8] sm:$0xff]  ;;  %v2066_v43 = vld [vmem:[%s2443_s9 + $0x200] sm:$0xff]  ;;  %v2067_v5 = vld [vmem:[%s2443_s9 + $0x208] sm:$0xff] }
 0x3e1   : > { %v2068_v52 = vld [vmem:[%s2443_s9 + $0x1f0] sm:$0xff] }
 0x3e2   : > { %1681 = vst [vmem:[%s2952_s15 + $0x110] sm:$0xff] %v1553_v18  ;;  %1682 = vst [vmem:[%s2952_s15 + $0x118] sm:$0xff] %v1554_v3 }
 0x3e3   : > { %1687 = vst [vmem:[%s2952_s15 + $0x140] sm:$0xff] %v1559_v10  ;;  %1688 = vst [vmem:[%s2952_s15 + $0x148] sm:$0xff] %v1560_v45  ;;  %v1336_v19 = vpop.permute.xlu1 %1335  ;;  %v1348_v62 = vpop.permute.xlu0 %1347 }
 0x3e4   : > { %v1557_v14 = vmul.f32 %v2044_v44, %v1336_v19  ;;  %v1558_v39 = vmul.f32 %v2045_v16, %v1336_v19  ;;  %v1563_v20 = vmul.f32 %v2046_v34, %v1348_v62  ;;  %v1564_v55 = vmul.f32 %v2047_v46, %v1348_v62  ;;  %v2069_v19 = vld [vmem:[%s2443_s9 + $0x1f8] sm:$0xff]  ;;  %v2070_v44 = vld [vmem:[%s2443_s9 + $0x220] sm:$0xff]  ;;  %v2071_v16 = vld [vmem:[%s2443_s9 + $0x228] sm:$0xff] }
 0x3e5   : > { %v2072_v46 = vld [vmem:[%s2443_s9 + $0x210] sm:$0xff] }
 0x3e6   : > { %1685 = vst [vmem:[%s2952_s15 + $0x130] sm:$0xff] %v1557_v14  ;;  %1686 = vst [vmem:[%s2952_s15 + $0x138] sm:$0xff] %v1558_v39 }
 0x3e7   : > { %1691 = vst [vmem:[%s2952_s15 + $0x160] sm:$0xff] %v1563_v20  ;;  %1692 = vst [vmem:[%s2952_s15 + $0x168] sm:$0xff] %v1564_v55  ;;  %v1344_v15 = vpop.permute.xlu1 %1343  ;;  %v1356_v35 = vpop.permute.xlu0 %1355 }
 0x3e8   : > { %v1561_v21 = vmul.f32 %v2048_v22, %v1344_v15  ;;  %v1562_v53 = vmul.f32 %v2049_v23, %v1344_v15  ;;  %v1567_v60 = vmul.f32 %v2050_v24, %v1356_v35  ;;  %v1568_v26 = vmul.f32 %v2051_v25, %v1356_v35  ;;  %v2073_v15 = vld [vmem:[%s2443_s9 + $0x218] sm:$0xff]  ;;  %v2074_v22 = vld [vmem:[%s2443_s9 + $0x240] sm:$0xff]  ;;  %v2075_v23 = vld [vmem:[%s2443_s9 + $0x248] sm:$0xff] }
 0x3e9   : > { %v2076_v25 = vld [vmem:[%s2443_s9 + $0x230] sm:$0xff] }
 0x3ea   : > { %1689 = vst [vmem:[%s2952_s15 + $0x150] sm:$0xff] %v1561_v21  ;;  %1690 = vst [vmem:[%s2952_s15 + $0x158] sm:$0xff] %v1562_v53 }
 0x3eb   : > { %1695 = vst [vmem:[%s2952_s15 + $0x180] sm:$0xff] %v1567_v60  ;;  %1696 = vst [vmem:[%s2952_s15 + $0x188] sm:$0xff] %v1568_v26  ;;  %v1352_v37 = vpop.permute.xlu1 %1351  ;;  %v1364_v58 = vpop.permute.xlu0 %1363 }
 0x3ec   : > { %v1565_v27 = vmul.f32 %v2052_v4, %v1352_v37  ;;  %v1566_v38 = vmul.f32 %v2053_v28, %v1352_v37  ;;  %v1571_v40 = vmul.f32 %v2054_v54, %v1364_v58  ;;  %v1572_v42 = vmul.f32 %v2055_v41, %v1364_v58  ;;  %v2077_v37 = vld [vmem:[%s2443_s9 + $0x238] sm:$0xff]  ;;  %v2078_v4 = vld [vmem:[%s2443_s9 + $0x260] sm:$0xff]  ;;  %v2079_v28 = vld [vmem:[%s2443_s9 + $0x268] sm:$0xff] }
 0x3ed   : > { %v2080_v41 = vld [vmem:[%s2443_s9 + $0x250] sm:$0xff] }
 0x3ee   : > { %1693 = vst [vmem:[%s2952_s15 + $0x170] sm:$0xff] %v1565_v27  ;;  %1694 = vst [vmem:[%s2952_s15 + $0x178] sm:$0xff] %v1566_v38 }
 0x3ef   : > { %1699 = vst [vmem:[%s2952_s15 + $0x1a0] sm:$0xff] %v1571_v40  ;;  %1700 = vst [vmem:[%s2952_s15 + $0x1a8] sm:$0xff] %v1572_v42  ;;  %v1360_v47 = vpop.permute.xlu1 %1359  ;;  %v1372_v48 = vpop.permute.xlu0 %1371 }
 0x3f0   : > { %v1569_v51 = vmul.f32 %v2056_v50, %v1360_v47  ;;  %v1570_v29 = vmul.f32 %v2057_v0, %v1360_v47  ;;  %v1575_v63 = vmul.f32 %v2058_v12, %v1372_v48  ;;  %v1576_v7 = vmul.f32 %v2059_v13, %v1372_v48  ;;  %v2081_v47 = vld [vmem:[%s2443_s9 + $0x258] sm:$0xff]  ;;  %v2082_v50 = vld [vmem:[%s2443_s9 + $0x280] sm:$0xff]  ;;  %v2083_v0 = vld [vmem:[%s2443_s9 + $0x288] sm:$0xff] }
 0x3f1   : > { %v2084_v13 = vld [vmem:[%s2443_s9 + $0x270] sm:$0xff] }
 0x3f2   : > { %1697 = vst [vmem:[%s2952_s15 + $0x190] sm:$0xff] %v1569_v51  ;;  %1698 = vst [vmem:[%s2952_s15 + $0x198] sm:$0xff] %v1570_v29 }
 0x3f3   : > { %1703 = vst [vmem:[%s2952_s15 + $0x1c0] sm:$0xff] %v1575_v63  ;;  %1704 = vst [vmem:[%s2952_s15 + $0x1c8] sm:$0xff] %v1576_v7  ;;  %v1368_v49 = vpop.permute.xlu1 %1367  ;;  %v1380_v8 = vpop.permute.xlu0 %1379 }
 0x3f4   : > { %v1573_v17 = vmul.f32 %v2060_v31, %v1368_v49  ;;  %v1574_v59 = vmul.f32 %v2061_v30, %v1368_v49  ;;  %v1579_v2 = vmul.f32 %v2062_v36, %v1380_v8  ;;  %v1580_v9 = vmul.f32 %v2063_v57, %v1380_v8  ;;  %v2085_v49 = vld [vmem:[%s2443_s9 + $0x278] sm:$0xff]  ;;  %v2086_v31 = vld [vmem:[%s2443_s9 + $0x2a0] sm:$0xff]  ;;  %v2087_v30 = vld [vmem:[%s2443_s9 + $0x2a8] sm:$0xff] }
 0x3f5   : > { %v2088_v57 = vld [vmem:[%s2443_s9 + $0x290] sm:$0xff] }
 0x3f6   : > { %1701 = vst [vmem:[%s2952_s15 + $0x1b0] sm:$0xff] %v1573_v17  ;;  %1702 = vst [vmem:[%s2952_s15 + $0x1b8] sm:$0xff] %v1574_v59 }
 0x3f7   : > { %1707 = vst [vmem:[%s2952_s15 + $0x1e0] sm:$0xff] %v1579_v2  ;;  %1708 = vst [vmem:[%s2952_s15 + $0x1e8] sm:$0xff] %v1580_v9  ;;  %v1376_v1 = vpop.permute.xlu1 %1375  ;;  %v1391_v56 = vpop.permute.xlu0 %1390 }
 0x3f8   : > { %v1577_v32 = vmul.f32 %v2064_v61, %v1376_v1  ;;  %v1578_v11 = vmul.f32 %v2065_v6, %v1376_v1  ;;  %v1583_v18 = vmul.f32 %v2066_v43, %v1391_v56  ;;  %v1584_v3 = vmul.f32 %v2067_v5, %v1391_v56  ;;  %v2089_v1 = vld [vmem:[%s2443_s9 + $0x298] sm:$0xff]  ;;  %v2090_v61 = vld [vmem:[%s2443_s9 + $0x2c0] sm:$0xff]  ;;  %v2091_v6 = vld [vmem:[%s2443_s9 + $0x2c8] sm:$0xff] }
 0x3f9   : > { %v2092_v5 = vld [vmem:[%s2443_s9 + $0x2b0] sm:$0xff] }
 0x3fa   : > { %1705 = vst [vmem:[%s2952_s15 + $0x1d0] sm:$0xff] %v1577_v32  ;;  %1706 = vst [vmem:[%s2952_s15 + $0x1d8] sm:$0xff] %v1578_v11 }
 0x3fb   : > { %1711 = vst [vmem:[%s2952_s15 + $0x200] sm:$0xff] %v1583_v18  ;;  %1712 = vst [vmem:[%s2952_s15 + $0x208] sm:$0xff] %v1584_v3  ;;  %v1384_v33 = vpop.permute.xlu1 %1383  ;;  %v1399_v10 = vpop.permute.xlu0 %1398 }
 0x3fc   : > { %v1581_v45 = vmul.f32 %v2068_v52, %v1384_v33  ;;  %v1582_v62 = vmul.f32 %v2069_v19, %v1384_v33  ;;  %v1587_v14 = vmul.f32 %v2070_v44, %v1399_v10  ;;  %v1588_v39 = vmul.f32 %v2071_v16, %v1399_v10  ;;  %v2093_v33 = vld [vmem:[%s2443_s9 + $0x2b8] sm:$0xff]  ;;  %v2094_v52 = vld [vmem:[%s2443_s9 + $0x2e0] sm:$0xff]  ;;  %v2095_v19 = vld [vmem:[%s2443_s9 + $0x2e8] sm:$0xff] }
 0x3fd   : > { %v2096_v16 = vld [vmem:[%s2443_s9 + $0x2d0] sm:$0xff] }
 0x3fe   : > { %1709 = vst [vmem:[%s2952_s15 + $0x1f0] sm:$0xff] %v1581_v45  ;;  %1710 = vst [vmem:[%s2952_s15 + $0x1f8] sm:$0xff] %v1582_v62 }
 0x3ff   : > { %1715 = vst [vmem:[%s2952_s15 + $0x220] sm:$0xff] %v1587_v14  ;;  %1716 = vst [vmem:[%s2952_s15 + $0x228] sm:$0xff] %v1588_v39  ;;  %v1395_v34 = vpop.permute.xlu1 %1394  ;;  %v1407_v20 = vpop.permute.xlu0 %1406 }
 0x400   : > { %v1585_v55 = vmul.f32 %v2072_v46, %v1395_v34  ;;  %v1586_v35 = vmul.f32 %v2073_v15, %v1395_v34  ;;  %v1591_v21 = vmul.f32 %v2074_v22, %v1407_v20  ;;  %v1592_v53 = vmul.f32 %v2075_v23, %v1407_v20  ;;  %v2097_v34 = vld [vmem:[%s2443_s9 + $0x2d8] sm:$0xff]  ;;  %v2098_v46 = vld [vmem:[%s2443_s9 + $0x300] sm:$0xff]  ;;  %v2099_v15 = vld [vmem:[%s2443_s9 + $0x308] sm:$0xff] }
 0x401   : > { %v2100_v23 = vld [vmem:[%s2443_s9 + $0x2f0] sm:$0xff] }
 0x402   : > { %1713 = vst [vmem:[%s2952_s15 + $0x210] sm:$0xff] %v1585_v55  ;;  %1714 = vst [vmem:[%s2952_s15 + $0x218] sm:$0xff] %v1586_v35 }
 0x403   : > { %1719 = vst [vmem:[%s2952_s15 + $0x240] sm:$0xff] %v1591_v21  ;;  %1720 = vst [vmem:[%s2952_s15 + $0x248] sm:$0xff] %v1592_v53  ;;  %v1403_v24 = vpop.permute.xlu1 %1402  ;;  %v1415_v60 = vpop.permute.xlu0 %1414 }
 0x404   : > { %v1589_v26 = vmul.f32 %v2076_v25, %v1403_v24  ;;  %v1590_v58 = vmul.f32 %v2077_v37, %v1403_v24  ;;  %v1595_v27 = vmul.f32 %v2078_v4, %v1415_v60  ;;  %v1596_v38 = vmul.f32 %v2079_v28, %v1415_v60  ;;  %v2101_v24 = vld [vmem:[%s2443_s9 + $0x2f8] sm:$0xff]  ;;  %v2102_v25 = vld [vmem:[%s2443_s9 + $0x320] sm:$0xff]  ;;  %v2103_v37 = vld [vmem:[%s2443_s9 + $0x328] sm:$0xff] }
 0x405   : > { %v2104_v28 = vld [vmem:[%s2443_s9 + $0x310] sm:$0xff] }
 0x406   : > { %1717 = vst [vmem:[%s2952_s15 + $0x230] sm:$0xff] %v1589_v26  ;;  %1718 = vst [vmem:[%s2952_s15 + $0x238] sm:$0xff] %v1590_v58 }
 0x407   : > { %1723 = vst [vmem:[%s2952_s15 + $0x260] sm:$0xff] %v1595_v27  ;;  %1724 = vst [vmem:[%s2952_s15 + $0x268] sm:$0xff] %v1596_v38  ;;  %v1411_v54 = vpop.permute.xlu1 %1410  ;;  %v1423_v40 = vpop.permute.xlu0 %1422 }
 0x408   : > { %v1593_v42 = vmul.f32 %v2080_v41, %v1411_v54  ;;  %v1594_v48 = vmul.f32 %v2081_v47, %v1411_v54  ;;  %v1599_v51 = vmul.f32 %v2082_v50, %v1423_v40  ;;  %v1600_v29 = vmul.f32 %v2083_v0, %v1423_v40  ;;  %v2105_v54 = vld [vmem:[%s2443_s9 + $0x318] sm:$0xff]  ;;  %v2106_v41 = vld [vmem:[%s2443_s9 + $0x340] sm:$0xff]  ;;  %v2107_v47 = vld [vmem:[%s2443_s9 + $0x348] sm:$0xff] }
 0x409   : > { %v2108_v0 = vld [vmem:[%s2443_s9 + $0x330] sm:$0xff] }
 0x40a   : > { %1721 = vst [vmem:[%s2952_s15 + $0x250] sm:$0xff] %v1593_v42  ;;  %1722 = vst [vmem:[%s2952_s15 + $0x258] sm:$0xff] %v1594_v48 }
 0x40b   : > { %1727 = vst [vmem:[%s2952_s15 + $0x280] sm:$0xff] %v1599_v51  ;;  %1728 = vst [vmem:[%s2952_s15 + $0x288] sm:$0xff] %v1600_v29  ;;  %v1419_v12 = vpop.permute.xlu1 %1418  ;;  %v1431_v63 = vpop.permute.xlu0 %1430 }
 0x40c   : > { %v1597_v7 = vmul.f32 %v2084_v13, %v1419_v12  ;;  %v1598_v8 = vmul.f32 %v2085_v49, %v1419_v12  ;;  %v1603_v17 = vmul.f32 %v2086_v31, %v1431_v63  ;;  %v1604_v59 = vmul.f32 %v2087_v30, %v1431_v63  ;;  %v2109_v12 = vld [vmem:[%s2443_s9 + $0x338] sm:$0xff]  ;;  %v2110_v13 = vld [vmem:[%s2443_s9 + $0x360] sm:$0xff]  ;;  %v2111_v49 = vld [vmem:[%s2443_s9 + $0x368] sm:$0xff] }
 0x40d   : > { %v2112_v30 = vld [vmem:[%s2443_s9 + $0x350] sm:$0xff] }
 0x40e   : > { %1725 = vst [vmem:[%s2952_s15 + $0x270] sm:$0xff] %v1597_v7  ;;  %1726 = vst [vmem:[%s2952_s15 + $0x278] sm:$0xff] %v1598_v8 }
 0x40f   : > { %1731 = vst [vmem:[%s2952_s15 + $0x2a0] sm:$0xff] %v1603_v17  ;;  %1732 = vst [vmem:[%s2952_s15 + $0x2a8] sm:$0xff] %v1604_v59  ;;  %v1427_v36 = vpop.permute.xlu1 %1426  ;;  %v1439_v2 = vpop.permute.xlu0 %1438 }
 0x410   : > { %v1601_v9 = vmul.f32 %v2088_v57, %v1427_v36  ;;  %v1602_v56 = vmul.f32 %v2089_v1, %v1427_v36  ;;  %v1607_v32 = vmul.f32 %v2090_v61, %v1439_v2  ;;  %v1608_v11 = vmul.f32 %v2091_v6, %v1439_v2  ;;  %v2113_v36 = vld [vmem:[%s2443_s9 + $0x358] sm:$0xff]  ;;  %v2114_v57 = vld [vmem:[%s2443_s9 + $0x380] sm:$0xff]  ;;  %v2115_v1 = vld [vmem:[%s2443_s9 + $0x388] sm:$0xff] }
 0x411   : > { %v2116_v6 = vld [vmem:[%s2443_s9 + $0x370] sm:$0xff] }
 0x412   : > { %1729 = vst [vmem:[%s2952_s15 + $0x290] sm:$0xff] %v1601_v9  ;;  %1730 = vst [vmem:[%s2952_s15 + $0x298] sm:$0xff] %v1602_v56 }
 0x413   : > { %1735 = vst [vmem:[%s2952_s15 + $0x2c0] sm:$0xff] %v1607_v32  ;;  %1736 = vst [vmem:[%s2952_s15 + $0x2c8] sm:$0xff] %v1608_v11  ;;  %v1435_v43 = vpop.permute.xlu1 %1434  ;;  %v1447_v18 = vpop.permute.xlu0 %1446 }
 0x414   : > { %v1605_v3 = vmul.f32 %v2092_v5, %v1435_v43  ;;  %v1606_v10 = vmul.f32 %v2093_v33, %v1435_v43  ;;  %v1611_v45 = vmul.f32 %v2094_v52, %v1447_v18  ;;  %v1612_v62 = vmul.f32 %v2095_v19, %v1447_v18  ;;  %v2117_v43 = vld [vmem:[%s2443_s9 + $0x378] sm:$0xff]  ;;  %v2118_v5 = vld [vmem:[%s2443_s9 + $0x3a0] sm:$0xff]  ;;  %v2119_v33 = vld [vmem:[%s2443_s9 + $0x3a8] sm:$0xff] }
 0x415   : > { %v2120_v19 = vld [vmem:[%s2443_s9 + $0x390] sm:$0xff] }
 0x416   : > { %1733 = vst [vmem:[%s2952_s15 + $0x2b0] sm:$0xff] %v1605_v3  ;;  %1734 = vst [vmem:[%s2952_s15 + $0x2b8] sm:$0xff] %v1606_v10 }
 0x417   : > { %1739 = vst [vmem:[%s2952_s15 + $0x2e0] sm:$0xff] %v1611_v45  ;;  %1740 = vst [vmem:[%s2952_s15 + $0x2e8] sm:$0xff] %v1612_v62  ;;  %v1443_v44 = vpop.permute.xlu1 %1442  ;;  %v1458_v14 = vpop.permute.xlu0 %1457 }
 0x418   : > { %v1609_v39 = vmul.f32 %v2096_v16, %v1443_v44  ;;  %v1610_v20 = vmul.f32 %v2097_v34, %v1443_v44  ;;  %v1615_v55 = vmul.f32 %v2098_v46, %v1458_v14  ;;  %v1616_v35 = vmul.f32 %v2099_v15, %v1458_v14  ;;  %v2121_v44 = vld [vmem:[%s2443_s9 + $0x398] sm:$0xff]  ;;  %v2122_v16 = vld [vmem:[%s2443_s9 + $0x3c0] sm:$0xff]  ;;  %v2123_v34 = vld [vmem:[%s2443_s9 + $0x3c8] sm:$0xff] }
 0x419   : > { %v2124_v15 = vld [vmem:[%s2443_s9 + $0x3b0] sm:$0xff] }
 0x41a   : > { %1737 = vst [vmem:[%s2952_s15 + $0x2d0] sm:$0xff] %v1609_v39  ;;  %1738 = vst [vmem:[%s2952_s15 + $0x2d8] sm:$0xff] %v1610_v20 }
 0x41b   : > { %1743 = vst [vmem:[%s2952_s15 + $0x300] sm:$0xff] %v1615_v55  ;;  %1744 = vst [vmem:[%s2952_s15 + $0x308] sm:$0xff] %v1616_v35  ;;  %v1451_v22 = vpop.permute.xlu1 %1450  ;;  %v1466_v21 = vpop.permute.xlu0 %1465 }
 0x41c   : > { %v1613_v53 = vmul.f32 %v2100_v23, %v1451_v22  ;;  %v1614_v60 = vmul.f32 %v2101_v24, %v1451_v22  ;;  %v1619_v26 = vmul.f32 %v2102_v25, %v1466_v21  ;;  %v1620_v58 = vmul.f32 %v2103_v37, %v1466_v21  ;;  %v2125_v22 = vld [vmem:[%s2443_s9 + $0x3b8] sm:$0xff]  ;;  %v2126_v23 = vld [vmem:[%s2443_s9 + $0x3e0] sm:$0xff]  ;;  %v2127_v24 = vld [vmem:[%s2443_s9 + $0x3e8] sm:$0xff] }
 0x41e   : > { %1741 = vst [vmem:[%s2952_s15 + $0x2f0] sm:$0xff] %v1613_v53  ;;  %1742 = vst [vmem:[%s2952_s15 + $0x2f8] sm:$0xff] %v1614_v60 }
 0x41f   : > { %1747 = vst [vmem:[%s2952_s15 + $0x320] sm:$0xff] %v1619_v26  ;;  %1748 = vst [vmem:[%s2952_s15 + $0x328] sm:$0xff] %v1620_v58  ;;  %v1462_v4 = vpop.permute.xlu1 %1461  ;;  %v1474_v27 = vpop.permute.xlu0 %1473  ;;  %v2128_v26 = vld [vmem:[%s2443_s9 + $0x3d0] sm:$0xff]  ;;  %v2129_v58 = vld [vmem:[%s2443_s9 + $0x3d8] sm:$0xff] }
 0x420   : > { %v1617_v38 = vmul.f32 %v2104_v28, %v1462_v4  ;;  %v1618_v40 = vmul.f32 %v2105_v54, %v1462_v4  ;;  %v1623_v42 = vmul.f32 %v2106_v41, %v1474_v27  ;;  %v1624_v48 = vmul.f32 %v2107_v47, %v1474_v27  ;;  %v2130_v28 = vld [vmem:[%s2443_s9 + $0x3f0] sm:$0xff]  ;;  %v2131_v54 = vld [vmem:[%s2443_s9 + $0x3f8] sm:$0xff] }
 0x422   : > { %1745 = vst [vmem:[%s2952_s15 + $0x310] sm:$0xff] %v1617_v38  ;;  %1746 = vst [vmem:[%s2952_s15 + $0x318] sm:$0xff] %v1618_v40 }
 0x423   : > { %1751 = vst [vmem:[%s2952_s15 + $0x340] sm:$0xff] %v1623_v42  ;;  %1752 = vst [vmem:[%s2952_s15 + $0x348] sm:$0xff] %v1624_v48  ;;  %v1470_v50 = vpop.permute.xlu1 %1469  ;;  %v1482_v51 = vpop.permute.xlu0 %1481 }
 0x424   : > { %v1621_v29 = vmul.f32 %v2108_v0, %v1470_v50  ;;  %v1622_v63 = vmul.f32 %v2109_v12, %v1470_v50  ;;  %v1627_v7 = vmul.f32 %v2110_v13, %v1482_v51  ;;  %v1628_v8 = vmul.f32 %v2111_v49, %v1482_v51 }
 0x426   : > { %1749 = vst [vmem:[%s2952_s15 + $0x330] sm:$0xff] %v1621_v29  ;;  %1750 = vst [vmem:[%s2952_s15 + $0x338] sm:$0xff] %v1622_v63 }
 0x427   : > { %1755 = vst [vmem:[%s2952_s15 + $0x360] sm:$0xff] %v1627_v7  ;;  %1756 = vst [vmem:[%s2952_s15 + $0x368] sm:$0xff] %v1628_v8  ;;  %v1478_v31 = vpop.permute.xlu1 %1477  ;;  %v1490_v17 = vpop.permute.xlu0 %1489 }
 0x428   : > { %v1625_v59 = vmul.f32 %v2112_v30, %v1478_v31  ;;  %v1626_v2 = vmul.f32 %v2113_v36, %v1478_v31  ;;  %v1631_v9 = vmul.f32 %v2114_v57, %v1490_v17  ;;  %v1632_v56 = vmul.f32 %v2115_v1, %v1490_v17 }
 0x42a   : > { %1753 = vst [vmem:[%s2952_s15 + $0x350] sm:$0xff] %v1625_v59  ;;  %1754 = vst [vmem:[%s2952_s15 + $0x358] sm:$0xff] %v1626_v2 }
 0x42b   : > { %1759 = vst [vmem:[%s2952_s15 + $0x380] sm:$0xff] %v1631_v9  ;;  %1760 = vst [vmem:[%s2952_s15 + $0x388] sm:$0xff] %v1632_v56  ;;  %v1486_v61 = vpop.permute.xlu1 %1485  ;;  %v1498_v32 = vpop.permute.xlu0 %1497 }
 0x42c   : > { %v1629_v11 = vmul.f32 %v2116_v6, %v1486_v61  ;;  %v1630_v18 = vmul.f32 %v2117_v43, %v1486_v61  ;;  %v1635_v3 = vmul.f32 %v2118_v5, %v1498_v32  ;;  %v1636_v10 = vmul.f32 %v2119_v33, %v1498_v32 }
 0x42e   : > { %1757 = vst [vmem:[%s2952_s15 + $0x370] sm:$0xff] %v1629_v11  ;;  %1758 = vst [vmem:[%s2952_s15 + $0x378] sm:$0xff] %v1630_v18 }
 0x42f   : > { %1763 = vst [vmem:[%s2952_s15 + $0x3a0] sm:$0xff] %v1635_v3  ;;  %1764 = vst [vmem:[%s2952_s15 + $0x3a8] sm:$0xff] %v1636_v10  ;;  %v1494_v52 = vpop.permute.xlu1 %1493  ;;  %v1506_v45 = vpop.permute.xlu0 %1505 }
 0x430   : > { %v1633_v62 = vmul.f32 %v2120_v19, %v1494_v52  ;;  %v1634_v14 = vmul.f32 %v2121_v44, %v1494_v52  ;;  %v1639_v39 = vmul.f32 %v2122_v16, %v1506_v45  ;;  %v1640_v20 = vmul.f32 %v2123_v34, %v1506_v45 }
 0x432   : > { %1761 = vst [vmem:[%s2952_s15 + $0x390] sm:$0xff] %v1633_v62  ;;  %1762 = vst [vmem:[%s2952_s15 + $0x398] sm:$0xff] %v1634_v14 }
 0x433   : > { %1767 = vst [vmem:[%s2952_s15 + $0x3c0] sm:$0xff] %v1639_v39  ;;  %1768 = vst [vmem:[%s2952_s15 + $0x3c8] sm:$0xff] %v1640_v20  ;;  %v1502_v46 = vpop.permute.xlu1 %1501  ;;  %v1514_v55 = vpop.permute.xlu0 %1513 }
 0x434   : > { %v1637_v35 = vmul.f32 %v2124_v15, %v1502_v46  ;;  %v1638_v21 = vmul.f32 %v2125_v22, %v1502_v46  ;;  %v1643_v53 = vmul.f32 %v2126_v23, %v1514_v55  ;;  %v1644_v60 = vmul.f32 %v2127_v24, %v1514_v55 }
 0x436   : > { %1765 = vst [vmem:[%s2952_s15 + $0x3b0] sm:$0xff] %v1637_v35  ;;  %1766 = vst [vmem:[%s2952_s15 + $0x3b8] sm:$0xff] %v1638_v21 }
 0x437   : > { %1771 = vst [vmem:[%s2952_s15 + $0x3e0] sm:$0xff] %v1643_v53  ;;  %1772 = vst [vmem:[%s2952_s15 + $0x3e8] sm:$0xff] %v1644_v60  ;;  %v1510_v25 = vpop.permute.xlu1 %1509 }
 0x438   : > { %v1641_v37 = vmul.f32 %v2128_v26, %v1510_v25  ;;  %v1642_v4 = vmul.f32 %v2129_v58, %v1510_v25  ;;  %1782 = sbr.rel (!%p3314_p9) target bundleno = 1115 (0x45b), region = 52 }
 0x43a   : > { %1769 = vst [vmem:[%s2952_s15 + $0x3d0] sm:$0xff] %v1641_v37  ;;  %1770 = vst [vmem:[%s2952_s15 + $0x3d8] sm:$0xff] %v1642_v4 }
 0x43b   : > { %v1518_v27 = vpop.permute.xlu1 %1517 }
 0x43c   : > { %v1645_v38 = vmul.f32 %v2130_v28, %v1518_v27  ;;  %v1646_v40 = vmul.f32 %v2131_v54, %v1518_v27 }
 0x43e   : > { %1773 = vst [vmem:[%s2952_s15 + $0x3f0] sm:$0xff] %v1645_v38  ;;  %1774 = vst [vmem:[%s2952_s15 + $0x3f8] sm:$0xff] %v1646_v40 }
 0x43f   : > { %s3323_s17 = smov (!%p1785_p10, %s1784_s17), 4 }
 0x440   : > { %s3214_s26 = sshll.u32 %s3323_s17, 12 }
 0x441   : > { %s1791_s8 = ssub.s32 16384, %s3214_s26 }
 0x442   : > { %1792 = vsyncadd %s1776_s28, %s1791_s8  ;;  %p1910_p1 = scmp.ne.s32.totalorder %s3214_s26, 0  ;;  %s1927_s30 = sshll.u32 %s2320_s22, 14 }
 0x443   : > { %s3224_s9 = scalar_lea.hbm %s3278_s5, %s1927_s30  ;;  %s1799_s29 = sshll.u32 %s2952_s15, 4  ;;  %s3227_s29 = int_to_ptr.vmem [resolvable:$true] %s1799_s29 }
 0x444   : > { %s2188_s7 = scalar_lea.vmem %s3227_s29, %s3214_s26  ;;  %s2266_s10 = smov [#allocation7]  }
 0x445   : > { %p2189_p7 = scmp.ne.s32.totalorder %s3227_s29, %s2188_s7  ;;  %s2192_s14 = sshll.u32 %s2266_s10, 4  ;;  %s2193_s14 = int_to_ptr.vmem [resolvable:$false] %s2192_s14 }
 0x446   : > { %s2194_s22 = scalar_lea.vmem %s2193_s14, 32768  ;;  %p2195_p11 = scmp.lt.s32.totalorder %s3227_s29, %s2193_s14 }
 0x447   : > { %p2190_p4 = pnand %p2189_p7, %p1910_p1  ;;  %p2196_p13 = scmp.lt.s32.totalorder %s2194_s22, %s2188_s7 }
 0x449   : > { %p2191_p6 = pneg %p2190_p4  ;;  %p2197_p2 = por %p2196_p13, %p2195_p11 }
 0x44b   : > { %p2198_p12 = pnand %p2197_p2, %p2191_p6 }
 0x44d   : > { %2201 = shalt.err (!%p2198_p12)
}
 0x44e   : > { %s2202_s23 = scalar_lea.hbm %s3224_s9, %s3214_s26  ;;  %s2206_s16 = scalar_lea.hbm %s3278_s5, 28672 }
 0x44f   : > { %p2203_p3 = scmp.ne.s32.totalorder %s3224_s9, %s2202_s23  ;;  %p2207_p9 = scmp.lt.u32.totalorder %s3224_s9, %s3278_s5 }
 0x450   : > { %p2208_p10 = scmp.lt.u32.totalorder %s2206_s16, %s2202_s23  ;;  %p2210_p4 = scmp.lt.u32.totalorder %s2202_s23, %s3224_s9 }
 0x451   : > { %p2204_p5 = pnand %p2203_p3, %p1910_p1 }
 0x452   : > { %p2209_p7 = por %p2208_p10, %p2207_p9 }
 0x453   : > { %p2205_p8 = pneg %p2204_p5 }
 0x454   : > { %p2211_p6 = por %p2210_p4, %p2209_p7 }
 0x456   : > { %p2212_p11 = pnand %p2211_p6, %p2205_p8 }
 0x458   : > { %2215 = shalt.err (!%p2212_p11)
}
 0x459   : > { %s2267_s30 = smov 256   ;;  %s2268_s12 = smov 16  }
 0x45a   : > { %1805 = dma.vmem_to_hbm [thread:$0]  (%p1910_p1), %s3227_s29, %s3214_s26, %s3224_s9, %s1776_s28, %s2267_s30, %s2267_s30, %s2268_s12  }
 0x45b PF: > { %s1814_s13 = sand.u32 1, %s2246_s18   ;;  %p3315_p13 = scmp.ne.s32.totalorder %s3290_s6, 0 }
 0x45c   : > { %s1815_s7 = scalar_lea.sflag [#allocation4], %s1814_s13 }
 0x45d   : > { %p1955_p2 = pnand %p1885_p0, %p3315_p13 }
 0x45f   : > { %2241 = dma.done.wait (!%p1955_p2), %s1815_s7, 16384  }
 0x460   : > { %2243 = vsyncadd (!%p1955_p2), %s1815_s7, 4294950912  ;;  %p19_p12 = scmp.ge.s32.totalorder %s2324_s24, 4   ;;  %s3316_s18 = smov %s2250_s19 }
 0x461   : > { %s3317_s19 = smov %s2254_s20  ;;  %s3318_s20 = smov %s2336_s27 }
 0x462   : > { %s3319_s21 = smov %s2324_s24  ;;  %21 = sbr.rel (!%p19_p12) target bundleno = 6 (0x6), region = 89 }
 0x469   :  { %1820 = vsyncpa [#allocation3], 1 }
 0x46a   :  { %1822 = vsyncpa [#allocation3 + $0x1], 1 }
 0x46b   :  { %1823 = vsyncpa [#allocation6], 1 }
 0x46c   :  { %1824 = vsyncpa [#allocation4], 1 }
 0x46d   :  { %1826 = vsyncpa [#allocation4 + $0x1], 1 }

</bundles_post_ra>
